<compile_context>
chip_gen: v7x
topology: tpu7x:2x2x1
jax: 0.10.0
libtpu: 0.0.40
codegen_flags: <defaults>
</compile_context>

<pallas_src>
import functools
import math

import jax
import jax.numpy as jnp
import numpy as np
from jax.experimental import pallas as pl
from jax.experimental.pallas import tpu as pltpu

_LANE = 128


def _round_up(n, m):
    return ((n + m - 1) // m) * m


# ------------------------------- Pallas kernels -------------------------------


def _fused_head_kernel(xp_ref, w0_ref, scale_ref, shift_ref, w1_ref, b_ref,
                       o_ref, *, H, W, k):
    """Last conv(kxk)+BN+ReLU fused with the final 1x1+bias; one image per grid step.

    xp_ref:    [H+2p, W+2p, Cin]  f32   spatially padded NHWC tile
    w0_ref:    [k*k, Cin, Cm]     bf16  packed conv weights (one [Cin, Cm] per tap)
    scale_ref: [1, Cm]            f32   BN scale (0 on padded channels)
    shift_ref: [1, Cm]            f32   BN shift
    w1_ref:    [Cm, No]           bf16  block-diagonal packed 1x1 weights
    b_ref:     [1, No]            f32   packed bias
    o_ref:     [H*W, No]          f32   lane-dense output slab
    """
    cin = xp_ref.shape[-1]
    cm = w0_ref.shape[-1]
    acc = jnp.zeros((H * W, cm), jnp.float32)
    t = 0
    for dy in range(k):
        for dx in range(k):
            tap = xp_ref[dy:dy + H, dx:dx + W, :].reshape(H * W, cin)
            acc = acc + jnp.dot(tap.astype(jnp.bfloat16), w0_ref[t],
                                preferred_element_type=jnp.float32)
            t += 1
    y = jnp.maximum(acc * scale_ref[...] + shift_ref[...], 0.0)
    out = jnp.dot(y.astype(jnp.bfloat16), w1_ref[...],
                  preferred_element_type=jnp.float32) + b_ref[...]
    o_ref[...] = out.astype(o_ref.dtype)


def _conv_bn_relu_kernel(xp_ref, w_ref, scale_ref, shift_ref, o_ref, *, H, W, k):
    """Standalone conv(kxk)+BN+ReLU (only used when num_conv > 2)."""
    cin = xp_ref.shape[-1]
    cm = w_ref.shape[-1]
    acc = jnp.zeros((H * W, cm), jnp.float32)
    t = 0
    for dy in range(k):
        for dx in range(k):
            tap = xp_ref[dy:dy + H, dx:dx + W, :].reshape(H * W, cin)
            acc = acc + jnp.dot(tap.astype(jnp.bfloat16), w_ref[t],
                                preferred_element_type=jnp.float32)
            t += 1
    y = jnp.maximum(acc * scale_ref[...] + shift_ref[...], 0.0)
    o_ref[...] = y.astype(o_ref.dtype)


def _linear_bias_kernel(x_ref, w_ref, b_ref, o_ref):
    """Final 1x1+bias straight on the input (only used when num_conv == 1)."""
    out = jnp.dot(x_ref[...].astype(jnp.bfloat16), w_ref[...],
                  preferred_element_type=jnp.float32) + b_ref[...]
    o_ref[...] = out.astype(o_ref.dtype)


# ----------------------------- pallas_call wrappers ----------------------------


def _fused_head_call(xp, w0, scale, shift, w1, b, H, W, k):
    B, Hp, Wp, Cin = xp.shape
    kk, _, Cm = w0.shape
    No = w1.shape[1]
    kern = functools.partial(_fused_head_kernel, H=H, W=W, k=k)
    return pl.pallas_call(
        kern,
        out_shape=jax.ShapeDtypeStruct((B, H * W, No), jnp.float32),
        grid=(B,),
        in_specs=[
            pl.BlockSpec((None, Hp, Wp, Cin), lambda i: (i, 0, 0, 0)),
            pl.BlockSpec((kk, Cin, Cm), lambda i: (0, 0, 0)),
            pl.BlockSpec((1, Cm), lambda i: (0, 0)),
            pl.BlockSpec((1, Cm), lambda i: (0, 0)),
            pl.BlockSpec((Cm, No), lambda i: (0, 0)),
            pl.BlockSpec((1, No), lambda i: (0, 0)),
        ],
        out_specs=pl.BlockSpec((None, H * W, No), lambda i: (i, 0, 0)),
        compiler_params=pltpu.CompilerParams(
            dimension_semantics=("parallel",)),
    )(xp, w0, scale, shift, w1, b)


def _conv_bn_relu_call(xp, w, scale, shift, H, W, k):
    B, Hp, Wp, Cin = xp.shape
    kk, _, Cm = w.shape
    kern = functools.partial(_conv_bn_relu_kernel, H=H, W=W, k=k)
    return pl.pallas_call(
        kern,
        out_shape=jax.ShapeDtypeStruct((B, H * W, Cm), jnp.float32),
        grid=(B,),
        in_specs=[
            pl.BlockSpec((None, Hp, Wp, Cin), lambda i: (i, 0, 0, 0)),
            pl.BlockSpec((kk, Cin, Cm), lambda i: (0, 0, 0)),
            pl.BlockSpec((1, Cm), lambda i: (0, 0)),
            pl.BlockSpec((1, Cm), lambda i: (0, 0)),
        ],
        out_specs=pl.BlockSpec((None, H * W, Cm), lambda i: (i, 0, 0)),
        compiler_params=pltpu.CompilerParams(
            dimension_semantics=("parallel",)),
    )(xp, w, scale, shift)


def _linear_bias_call(x_rows, w, b):
    B, M, Cin = x_rows.shape
    No = w.shape[1]
    return pl.pallas_call(
        _linear_bias_kernel,
        out_shape=jax.ShapeDtypeStruct((B, M, No), jnp.float32),
        grid=(B,),
        in_specs=[
            pl.BlockSpec((None, M, Cin), lambda i: (i, 0, 0)),
            pl.BlockSpec((Cin, No), lambda i: (0, 0)),
            pl.BlockSpec((1, No), lambda i: (0, 0)),
        ],
        out_specs=pl.BlockSpec((None, M, No), lambda i: (i, 0, 0)),
        compiler_params=pltpu.CompilerParams(
            dimension_semantics=("parallel",)),
    )(x_rows, w, b)


# --------------------------------- module glue ---------------------------------


class SeparateHeadPallas:
    def __init__(self, input_channels, sep_head_dict, kernel_size,
                 init_bias=-2.19, use_bias=False, key=None):
        assert not use_bias  # intermediate convs are bias-free in the reference default
        if key is None:
            key = jax.random.PRNGKey(0)
        self.sep_head_dict = sep_head_dict
        self.kernel_size = int(kernel_size)
        self.input_channels = int(input_channels)
        C = self.input_channels
        k = self.kernel_size
        bn_eps = 1e-5
        bn_scale = 1.0 / math.sqrt(1.0 + bn_eps)  # eval-mode BN with fresh stats

        # Per-head unpacked f32 params, kept for the pure-JAX reference check.
        self.ref_params = {}

        # Group heads that share num_conv -> one packed/fused chain per group.
        by_nc = {}
        for name in sep_head_dict:
            by_nc.setdefault(int(sep_head_dict[name]['num_conv']), []).append(name)

        self.groups = []
        for nc, names in by_nc.items():
            G = len(names)
            outs = [int(sep_head_dict[n]['out_channels']) for n in names]
            sum_out = int(sum(outs))
            offsets = [int(v) for v in np.cumsum([0] + outs[:-1])]
            Cm = G * C
            Cm_pad = _round_up(Cm, _LANE)
            No_pad = _round_up(sum_out, _LANE)

            for n in names:
                self.ref_params[n] = dict(convs=[], w1=None, b1=None)

            # Intermediate conv + BN + ReLU layers (packed across heads).
            conv_layers = []
            for layer_idx in range(nc - 1):
                in_width = C if layer_idx == 0 else Cm_pad
                w_packed = np.zeros((k, k, in_width, Cm_pad), np.float32)
                for h, name in enumerate(names):
                    key, wk = jax.random.split(key)
                    std = math.sqrt(2.0 / (k * k * C)) if 'heatmap' in name else 1e-3
                    w_h = np.asarray(
                        std * jax.random.normal(wk, (k, k, C, C), jnp.float32))
                    self.ref_params[name]['convs'].append((jnp.asarray(w_h), bn_scale))
                    if layer_idx == 0:
                        w_packed[:, :, :, h * C:(h + 1) * C] = w_h
                    else:  # block-diagonal on the packed intermediate channels
                        w_packed[:, :, h * C:(h + 1) * C, h * C:(h + 1) * C] = w_h
                scale = np.zeros((1, Cm_pad), np.float32)
                scale[0, :Cm] = bn_scale
                shift = np.zeros((1, Cm_pad), np.float32)
                conv_layers.append(dict(
                    w=jnp.asarray(w_packed.reshape(k * k, in_width, Cm_pad),
                                  jnp.bfloat16),
                    scale=jnp.asarray(scale),
                    shift=jnp.asarray(shift)))

            # Final 1x1 conv with bias, packed block-diagonally over heads.
            in_final = C if nc == 1 else Cm_pad
            w1_packed = np.zeros((in_final, No_pad), np.float32)
            b_packed = np.zeros((1, No_pad), np.float32)
            for h, name in enumerate(names):
                oc, off = outs[h], offsets[h]
                key, wk, bk = jax.random.split(key, 3)
                if 'heatmap' in name:
                    std = math.sqrt(2.0 / C)
                    w1_h = np.asarray(std * jax.random.normal(wk, (C, oc), jnp.float32))
                    b_h = np.full((oc,), float(init_bias), np.float32)
                else:
                    w1_h = np.asarray(1e-3 * jax.random.normal(wk, (C, oc), jnp.float32))
                    bound = 1.0 / math.sqrt(C)
                    b_h = np.asarray(
                        jax.random.uniform(bk, (oc,), jnp.float32, -bound, bound))
                self.ref_params[name]['w1'] = jnp.asarray(w1_h)
                self.ref_params[name]['b1'] = jnp.asarray(b_h)
                row0 = 0 if nc == 1 else h * C
                w1_packed[row0:row0 + C, off:off + oc] = w1_h
                b_packed[0, off:off + oc] = b_h

            self.groups.append(dict(
                num_conv=nc, names=names, outs=outs, offsets=offsets,
                sum_out=sum_out, conv_layers=conv_layers,
                w1=jnp.asarray(w1_packed, jnp.bfloat16),
                b=jnp.asarray(b_packed)))

    def __call__(self, x_nchw):
        k = self.kernel_size
        p = k // 2
        x = jnp.transpose(x_nchw, (0, 2, 3, 1)).astype(jnp.float32)  # NHWC
        B, H, W, _ = x.shape
        ret = {}
        for g in self.groups:
            nc = g['num_conv']
            if nc == 1:
                slab = _linear_bias_call(x.reshape(B, H * W, -1), g['w1'], g['b'])
            else:
                feat = x
                for layer in g['conv_layers'][:-1]:  # only runs when num_conv > 2
                    xp = jnp.pad(feat, ((0, 0), (p, p), (p, p), (0, 0)))
                    y = _conv_bn_relu_call(xp, layer['w'], layer['scale'],
                                           layer['shift'], H, W, k)
                    feat = y.reshape(B, H, W, -1)
                last = g['conv_layers'][-1]
                xp = jnp.pad(feat, ((0, 0), (p, p), (p, p), (0, 0)))
                slab = _fused_head_call(xp, last['w'], last['scale'], last['shift'],
                                        g['w1'], g['b'], H, W, k)
            # One slice + one NCHW transpose for the whole head group.
            dense = slab[:, :, :g['sum_out']].reshape(B, H, W, g['sum_out'])
            dense = jnp.transpose(dense, (0, 3, 1, 2))
            for name, oc, off in zip(g['names'], g['outs'], g['offsets']):
                ret[name] = dense[:, off:off + oc]
        # Preserve the original head ordering of sep_head_dict.
        return {name: ret[name] for name in self.sep_head_dict}


def _reference_forward(x_nchw, ref_params, kernel_size):
    """Pure-JAX reference (lax.conv) mimicking the kernel's bf16 rounding."""
    p = kernel_size // 2

    def bf(a):
        return a.astype(jnp.bfloat16).astype(jnp.float32)

    x = jnp.transpose(x_nchw, (0, 2, 3, 1)).astype(jnp.float32)
    out = {}
    for name, prm in ref_params.items():
        feat = x
        for w, scale in prm['convs']:
            y = jax.lax.conv_general_dilated(
                bf(feat), bf(w), window_strides=(1, 1),
                padding=((p, p), (p, p)),
                dimension_numbers=('NHWC', 'HWIO', 'NHWC'),
                precision=jax.lax.Precision.HIGHEST)
            feat = jnp.maximum(y * scale, 0.0)
        y = jnp.einsum('bhwc,co->bhwo', bf(feat), bf(prm['w1']),
                       precision=jax.lax.Precision.HIGHEST) + prm['b1']
        out[name] = jnp.transpose(y, (0, 3, 1, 2))
    return out


if __name__ == "__main__":
    B, C, H, W = 2, 32, 16, 16
    kernel_size = 3
    sep_head_dict = {
        'heatmap':  {'out_channels': 2, 'num_conv': 2},
        'center':   {'out_channels': 2, 'num_conv': 2},
        'center_z': {'out_channels': 1, 'num_conv': 2},
        'dim':      {'out_channels': 3, 'num_conv': 2},
    }

    key = jax.random.PRNGKey(0)
    k_x, k_params = jax.random.split(key)
    x = jax.random.normal(k_x, (B, C, H, W), jnp.float32)

    head = SeparateHeadPallas(C, sep_head_dict, kernel_size, init_bias=-2.19,
                              use_bias=False, key=k_params)
    out = head(x)
    for name, v in out.items():
        jax.block_until_ready(v)
        expected = (B, sep_head_dict[name]['out_channels'], H, W)
        assert v.shape == expected, (name, v.shape, expected)

    # Correctness check against a pure-JAX reference (bf16-rounding matched).
    ref = _reference_forward(x, head.ref_params, kernel_size)
    for name in sep_head_dict:
        assert bool(jnp.allclose(out[name], ref[name], rtol=5e-2, atol=1e-2)), (
            f"mismatch in head {name}")

    print("KERNEL_OK")
</pallas_src>

<mosaic_0001>
module attributes {stable_mosaic.version = 11 : i64} {
  func.func @_fused_head_kernel(%arg0: i32, %arg1: memref<1x18x18x32xf32, #tpu.memory_space<vmem>>, %arg2: memref<9x32x128xbf16, #tpu.memory_space<vmem>>, %arg3: memref<1x128xf32, #tpu.memory_space<vmem>>, %arg4: memref<1x128xf32, #tpu.memory_space<vmem>>, %arg5: memref<128x128xbf16, #tpu.memory_space<vmem>>, %arg6: memref<1x128xf32, #tpu.memory_space<vmem>>, %arg7: memref<1x256x128xf32, #tpu.memory_space<vmem>>) attributes {dimension_semantics = [#tpu.dimension_semantics<parallel>], iteration_bounds = array<i64: 2>, scalar_prefetch = 0 : i64, scratch_operands = 0 : i64, tpu.core_type = #tpu.core_type<tc>, window_params = [{transform_indices = @transform_0, window_bounds = array<i64: 1, 18, 18, 32>}, {pipeline_mode = #tpu.pipeline_mode<synchronous>, transform_indices = @transform_1, window_bounds = array<i64: 9, 32, 128>}, {pipeline_mode = #tpu.pipeline_mode<synchronous>, transform_indices = @transform_2, window_bounds = array<i64: 1, 128>}, {pipeline_mode = #tpu.pipeline_mode<synchronous>, transform_indices = @transform_3, window_bounds = array<i64: 1, 128>}, {pipeline_mode = #tpu.pipeline_mode<synchronous>, transform_indices = @transform_4, window_bounds = array<i64: 128, 128>}, {pipeline_mode = #tpu.pipeline_mode<synchronous>, transform_indices = @transform_5, window_bounds = array<i64: 1, 128>}, {transform_indices = @transform_6, window_bounds = array<i64: 1, 256, 128>}]} {
    %cst = arith.constant 0.000000e+00 : f32
    %0 = vector.broadcast %cst : f32 to vector<256x128xf32>
    %c0 = arith.constant 0 : index
    %c0_0 = arith.constant 0 : index
    %c0_1 = arith.constant 0 : index
    %c0_2 = arith.constant 0 : index
    %1 = vector.load %arg1[%c0, %c0_0, %c0_1, %c0_2] : memref<1x18x18x32xf32, #tpu.memory_space<vmem>>, vector<1x16x16x32xf32>
    %2 = vector.shape_cast %1 : vector<1x16x16x32xf32> to vector<16x16x32xf32>
    %3 = vector.shape_cast %2 : vector<16x16x32xf32> to vector<256x32xf32>
    %4 = arith.truncf %3 : vector<256x32xf32> to vector<256x32xbf16>
    %c0_3 = arith.constant 0 : index
    %c0_4 = arith.constant 0 : index
    %c0_5 = arith.constant 0 : index
    %5 = vector.load %arg2[%c0_3, %c0_4, %c0_5] : memref<9x32x128xbf16, #tpu.memory_space<vmem>>, vector<1x32x128xbf16>
    %6 = vector.shape_cast %5 : vector<1x32x128xbf16> to vector<32x128xbf16>
    %cst_6 = arith.constant dense<0.000000e+00> : vector<256x128xf32>
    %7 = tpu.matmul %4, %6, %cst_6 {dimension_numbers = #tpu.dot_dimension_numbers<[1], [0], [0], [1], [0, 0, 1, 1], [], []>} : vector<256x32xbf16>, vector<32x128xbf16>, vector<256x128xf32> -> vector<256x128xf32>
    %8 = arith.addf %0, %7 : vector<256x128xf32>
    %c0_7 = arith.constant 0 : index
    %c0_8 = arith.constant 0 : index
    %c1 = arith.constant 1 : index
    %c0_9 = arith.constant 0 : index
    %9 = vector.load %arg1[%c0_7, %c0_8, %c1, %c0_9] : memref<1x18x18x32xf32, #tpu.memory_space<vmem>>, vector<1x16x16x32xf32>
    %10 = vector.shape_cast %9 : vector<1x16x16x32xf32> to vector<16x16x32xf32>
    %11 = vector.shape_cast %10 : vector<16x16x32xf32> to vector<256x32xf32>
    %12 = arith.truncf %11 : vector<256x32xf32> to vector<256x32xbf16>
    %c1_10 = arith.constant 1 : index
    %c0_11 = arith.constant 0 : index
    %c0_12 = arith.constant 0 : index
    %13 = vector.load %arg2[%c1_10, %c0_11, %c0_12] : memref<9x32x128xbf16, #tpu.memory_space<vmem>>, vector<1x32x128xbf16>
    %14 = vector.shape_cast %13 : vector<1x32x128xbf16> to vector<32x128xbf16>
    %cst_13 = arith.constant dense<0.000000e+00> : vector<256x128xf32>
    %15 = tpu.matmul %12, %14, %cst_13 {dimension_numbers = #tpu.dot_dimension_numbers<[1], [0], [0], [1], [0, 0, 1, 1], [], []>} : vector<256x32xbf16>, vector<32x128xbf16>, vector<256x128xf32> -> vector<256x128xf32>
    %16 = arith.addf %8, %15 : vector<256x128xf32>
    %c0_14 = arith.constant 0 : index
    %c0_15 = arith.constant 0 : index
    %c2 = arith.constant 2 : index
    %c0_16 = arith.constant 0 : index
    %17 = vector.load %arg1[%c0_14, %c0_15, %c2, %c0_16] : memref<1x18x18x32xf32, #tpu.memory_space<vmem>>, vector<1x16x16x32xf32>
    %18 = vector.shape_cast %17 : vector<1x16x16x32xf32> to vector<16x16x32xf32>
    %19 = vector.shape_cast %18 : vector<16x16x32xf32> to vector<256x32xf32>
    %20 = arith.truncf %19 : vector<256x32xf32> to vector<256x32xbf16>
    %c2_17 = arith.constant 2 : index
    %c0_18 = arith.constant 0 : index
    %c0_19 = arith.constant 0 : index
    %21 = vector.load %arg2[%c2_17, %c0_18, %c0_19] : memref<9x32x128xbf16, #tpu.memory_space<vmem>>, vector<1x32x128xbf16>
    %22 = vector.shape_cast %21 : vector<1x32x128xbf16> to vector<32x128xbf16>
    %cst_20 = arith.constant dense<0.000000e+00> : vector<256x128xf32>
    %23 = tpu.matmul %20, %22, %cst_20 {dimension_numbers = #tpu.dot_dimension_numbers<[1], [0], [0], [1], [0, 0, 1, 1], [], []>} : vector<256x32xbf16>, vector<32x128xbf16>, vector<256x128xf32> -> vector<256x128xf32>
    %24 = arith.addf %16, %23 : vector<256x128xf32>
    %c0_21 = arith.constant 0 : index
    %c1_22 = arith.constant 1 : index
    %c0_23 = arith.constant 0 : index
    %c0_24 = arith.constant 0 : index
    %25 = vector.load %arg1[%c0_21, %c1_22, %c0_23, %c0_24] : memref<1x18x18x32xf32, #tpu.memory_space<vmem>>, vector<1x16x16x32xf32>
    %26 = vector.shape_cast %25 : vector<1x16x16x32xf32> to vector<16x16x32xf32>
    %27 = vector.shape_cast %26 : vector<16x16x32xf32> to vector<256x32xf32>
    %28 = arith.truncf %27 : vector<256x32xf32> to vector<256x32xbf16>
    %c3 = arith.constant 3 : index
    %c0_25 = arith.constant 0 : index
    %c0_26 = arith.constant 0 : index
    %29 = vector.load %arg2[%c3, %c0_25, %c0_26] : memref<9x32x128xbf16, #tpu.memory_space<vmem>>, vector<1x32x128xbf16>
    %30 = vector.shape_cast %29 : vector<1x32x128xbf16> to vector<32x128xbf16>
    %cst_27 = arith.constant dense<0.000000e+00> : vector<256x128xf32>
    %31 = tpu.matmul %28, %30, %cst_27 {dimension_numbers = #tpu.dot_dimension_numbers<[1], [0], [0], [1], [0, 0, 1, 1], [], []>} : vector<256x32xbf16>, vector<32x128xbf16>, vector<256x128xf32> -> vector<256x128xf32>
    %32 = arith.addf %24, %31 : vector<256x128xf32>
    %c0_28 = arith.constant 0 : index
    %c1_29 = arith.constant 1 : index
    %c1_30 = arith.constant 1 : index
    %c0_31 = arith.constant 0 : index
    %33 = vector.load %arg1[%c0_28, %c1_29, %c1_30, %c0_31] : memref<1x18x18x32xf32, #tpu.memory_space<vmem>>, vector<1x16x16x32xf32>
    %34 = vector.shape_cast %33 : vector<1x16x16x32xf32> to vector<16x16x32xf32>
    %35 = vector.shape_cast %34 : vector<16x16x32xf32> to vector<256x32xf32>
    %36 = arith.truncf %35 : vector<256x32xf32> to vector<256x32xbf16>
    %c4 = arith.constant 4 : index
    %c0_32 = arith.constant 0 : index
    %c0_33 = arith.constant 0 : index
    %37 = vector.load %arg2[%c4, %c0_32, %c0_33] : memref<9x32x128xbf16, #tpu.memory_space<vmem>>, vector<1x32x128xbf16>
    %38 = vector.shape_cast %37 : vector<1x32x128xbf16> to vector<32x128xbf16>
    %cst_34 = arith.constant dense<0.000000e+00> : vector<256x128xf32>
    %39 = tpu.matmul %36, %38, %cst_34 {dimension_numbers = #tpu.dot_dimension_numbers<[1], [0], [0], [1], [0, 0, 1, 1], [], []>} : vector<256x32xbf16>, vector<32x128xbf16>, vector<256x128xf32> -> vector<256x128xf32>
    %40 = arith.addf %32, %39 : vector<256x128xf32>
    %c0_35 = arith.constant 0 : index
    %c1_36 = arith.constant 1 : index
    %c2_37 = arith.constant 2 : index
    %c0_38 = arith.constant 0 : index
    %41 = vector.load %arg1[%c0_35, %c1_36, %c2_37, %c0_38] : memref<1x18x18x32xf32, #tpu.memory_space<vmem>>, vector<1x16x16x32xf32>
    %42 = vector.shape_cast %41 : vector<1x16x16x32xf32> to vector<16x16x32xf32>
    %43 = vector.shape_cast %42 : vector<16x16x32xf32> to vector<256x32xf32>
    %44 = arith.truncf %43 : vector<256x32xf32> to vector<256x32xbf16>
    %c5 = arith.constant 5 : index
    %c0_39 = arith.constant 0 : index
    %c0_40 = arith.constant 0 : index
    %45 = vector.load %arg2[%c5, %c0_39, %c0_40] : memref<9x32x128xbf16, #tpu.memory_space<vmem>>, vector<1x32x128xbf16>
    %46 = vector.shape_cast %45 : vector<1x32x128xbf16> to vector<32x128xbf16>
    %cst_41 = arith.constant dense<0.000000e+00> : vector<256x128xf32>
    %47 = tpu.matmul %44, %46, %cst_41 {dimension_numbers = #tpu.dot_dimension_numbers<[1], [0], [0], [1], [0, 0, 1, 1], [], []>} : vector<256x32xbf16>, vector<32x128xbf16>, vector<256x128xf32> -> vector<256x128xf32>
    %48 = arith.addf %40, %47 : vector<256x128xf32>
    %c0_42 = arith.constant 0 : index
    %c2_43 = arith.constant 2 : index
    %c0_44 = arith.constant 0 : index
    %c0_45 = arith.constant 0 : index
    %49 = vector.load %arg1[%c0_42, %c2_43, %c0_44, %c0_45] : memref<1x18x18x32xf32, #tpu.memory_space<vmem>>, vector<1x16x16x32xf32>
    %50 = vector.shape_cast %49 : vector<1x16x16x32xf32> to vector<16x16x32xf32>
    %51 = vector.shape_cast %50 : vector<16x16x32xf32> to vector<256x32xf32>
    %52 = arith.truncf %51 : vector<256x32xf32> to vector<256x32xbf16>
    %c6 = arith.constant 6 : index
    %c0_46 = arith.constant 0 : index
    %c0_47 = arith.constant 0 : index
    %53 = vector.load %arg2[%c6, %c0_46, %c0_47] : memref<9x32x128xbf16, #tpu.memory_space<vmem>>, vector<1x32x128xbf16>
    %54 = vector.shape_cast %53 : vector<1x32x128xbf16> to vector<32x128xbf16>
    %cst_48 = arith.constant dense<0.000000e+00> : vector<256x128xf32>
    %55 = tpu.matmul %52, %54, %cst_48 {dimension_numbers = #tpu.dot_dimension_numbers<[1], [0], [0], [1], [0, 0, 1, 1], [], []>} : vector<256x32xbf16>, vector<32x128xbf16>, vector<256x128xf32> -> vector<256x128xf32>
    %56 = arith.addf %48, %55 : vector<256x128xf32>
    %c0_49 = arith.constant 0 : index
    %c2_50 = arith.constant 2 : index
    %c1_51 = arith.constant 1 : index
    %c0_52 = arith.constant 0 : index
    %57 = vector.load %arg1[%c0_49, %c2_50, %c1_51, %c0_52] : memref<1x18x18x32xf32, #tpu.memory_space<vmem>>, vector<1x16x16x32xf32>
    %58 = vector.shape_cast %57 : vector<1x16x16x32xf32> to vector<16x16x32xf32>
    %59 = vector.shape_cast %58 : vector<16x16x32xf32> to vector<256x32xf32>
    %60 = arith.truncf %59 : vector<256x32xf32> to vector<256x32xbf16>
    %c7 = arith.constant 7 : index
    %c0_53 = arith.constant 0 : index
    %c0_54 = arith.constant 0 : index
    %61 = vector.load %arg2[%c7, %c0_53, %c0_54] : memref<9x32x128xbf16, #tpu.memory_space<vmem>>, vector<1x32x128xbf16>
    %62 = vector.shape_cast %61 : vector<1x32x128xbf16> to vector<32x128xbf16>
    %cst_55 = arith.constant dense<0.000000e+00> : vector<256x128xf32>
    %63 = tpu.matmul %60, %62, %cst_55 {dimension_numbers = #tpu.dot_dimension_numbers<[1], [0], [0], [1], [0, 0, 1, 1], [], []>} : vector<256x32xbf16>, vector<32x128xbf16>, vector<256x128xf32> -> vector<256x128xf32>
    %64 = arith.addf %56, %63 : vector<256x128xf32>
    %c0_56 = arith.constant 0 : index
    %c2_57 = arith.constant 2 : index
    %c2_58 = arith.constant 2 : index
    %c0_59 = arith.constant 0 : index
    %65 = vector.load %arg1[%c0_56, %c2_57, %c2_58, %c0_59] : memref<1x18x18x32xf32, #tpu.memory_space<vmem>>, vector<1x16x16x32xf32>
    %66 = vector.shape_cast %65 : vector<1x16x16x32xf32> to vector<16x16x32xf32>
    %67 = vector.shape_cast %66 : vector<16x16x32xf32> to vector<256x32xf32>
    %68 = arith.truncf %67 : vector<256x32xf32> to vector<256x32xbf16>
    %c8 = arith.constant 8 : index
    %c0_60 = arith.constant 0 : index
    %c0_61 = arith.constant 0 : index
    %69 = vector.load %arg2[%c8, %c0_60, %c0_61] : memref<9x32x128xbf16, #tpu.memory_space<vmem>>, vector<1x32x128xbf16>
    %70 = vector.shape_cast %69 : vector<1x32x128xbf16> to vector<32x128xbf16>
    %cst_62 = arith.constant dense<0.000000e+00> : vector<256x128xf32>
    %71 = tpu.matmul %68, %70, %cst_62 {dimension_numbers = #tpu.dot_dimension_numbers<[1], [0], [0], [1], [0, 0, 1, 1], [], []>} : vector<256x32xbf16>, vector<32x128xbf16>, vector<256x128xf32> -> vector<256x128xf32>
    %72 = arith.addf %64, %71 : vector<256x128xf32>
    %c0_63 = arith.constant 0 : index
    %c0_64 = arith.constant 0 : index
    %73 = vector.load %arg3[%c0_63, %c0_64] : memref<1x128xf32, #tpu.memory_space<vmem>>, vector<1x128xf32>
    %74 = vector.broadcast %73 : vector<1x128xf32> to vector<256x128xf32>
    %75 = arith.mulf %72, %74 : vector<256x128xf32>
    %c0_65 = arith.constant 0 : index
    %c0_66 = arith.constant 0 : index
    %76 = vector.load %arg4[%c0_65, %c0_66] : memref<1x128xf32, #tpu.memory_space<vmem>>, vector<1x128xf32>
    %77 = vector.broadcast %76 : vector<1x128xf32> to vector<256x128xf32>
    %78 = arith.addf %75, %77 : vector<256x128xf32>
    %cst_67 = arith.constant 0.000000e+00 : f32
    %79 = vector.broadcast %cst_67 : f32 to vector<256x128xf32>
    %80 = arith.maximumf %78, %79 : vector<256x128xf32>
    %81 = arith.truncf %80 : vector<256x128xf32> to vector<256x128xbf16>
    %c0_68 = arith.constant 0 : index
    %c0_69 = arith.constant 0 : index
    %82 = vector.load %arg5[%c0_68, %c0_69] : memref<128x128xbf16, #tpu.memory_space<vmem>>, vector<128x128xbf16>
    %cst_70 = arith.constant dense<0.000000e+00> : vector<256x128xf32>
    %83 = tpu.matmul %81, %82, %cst_70 {dimension_numbers = #tpu.dot_dimension_numbers<[1], [0], [0], [1], [0, 0, 1, 1], [], []>} : vector<256x128xbf16>, vector<128x128xbf16>, vector<256x128xf32> -> vector<256x128xf32>
    %c0_71 = arith.constant 0 : index
    %c0_72 = arith.constant 0 : index
    %84 = vector.load %arg6[%c0_71, %c0_72] : memref<1x128xf32, #tpu.memory_space<vmem>>, vector<1x128xf32>
    %85 = vector.broadcast %84 : vector<1x128xf32> to vector<256x128xf32>
    %86 = arith.addf %83, %85 : vector<256x128xf32>
    %c0_73 = arith.constant 0 : index
    %c0_74 = arith.constant 0 : index
    %c0_75 = arith.constant 0 : index
    %87 = vector.load %arg7[%c0_73, %c0_74, %c0_75] : memref<1x256x128xf32, #tpu.memory_space<vmem>>, vector<1x256x128xf32>
    %88 = vector.shape_cast %87 : vector<1x256x128xf32> to vector<256x128xf32>
    %89 = vector.shape_cast %86 : vector<256x128xf32> to vector<1x256x128xf32>
    tpu.vector_store %arg7[%c0_73, %c0_74, %c0_75], %89 {strides = array<i32>} : memref<1x256x128xf32, #tpu.memory_space<vmem>>, vector<1x256x128xf32>,
    return
  }
  func.func @transform_0(%arg0: i32) -> (i32, i32, i32, i32) {
    %c0_i32 = arith.constant 0 : i32
    %c0_i32_0 = arith.constant 0 : i32
    %c0_i32_1 = arith.constant 0 : i32
    %c0_i32_2 = arith.constant 0 : i32
    return %arg0, %c0_i32, %c0_i32_0, %c0_i32_1 : i32, i32, i32, i32
  }
  func.func @transform_1(%arg0: i32) -> (i32, i32, i32) {
    %c0_i32 = arith.constant 0 : i32
    %c0_i32_0 = arith.constant 0 : i32
    %c0_i32_1 = arith.constant 0 : i32
    %c0_i32_2 = arith.constant 0 : i32
    return %c0_i32, %c0_i32_0, %c0_i32_1 : i32, i32, i32
  }
  func.func @transform_2(%arg0: i32) -> (i32, i32) {
    %c0_i32 = arith.constant 0 : i32
    %c0_i32_0 = arith.constant 0 : i32
    %c0_i32_1 = arith.constant 0 : i32
    return %c0_i32, %c0_i32_0 : i32, i32
  }
  func.func @transform_3(%arg0: i32) -> (i32, i32) {
    %c0_i32 = arith.constant 0 : i32
    %c0_i32_0 = arith.constant 0 : i32
    %c0_i32_1 = arith.constant 0 : i32
    return %c0_i32, %c0_i32_0 : i32, i32
  }
  func.func @transform_4(%arg0: i32) -> (i32, i32) {
    %c0_i32 = arith.constant 0 : i32
    %c0_i32_0 = arith.constant 0 : i32
    %c0_i32_1 = arith.constant 0 : i32
    return %c0_i32, %c0_i32_0 : i32, i32
  }
  func.func @transform_5(%arg0: i32) -> (i32, i32) {
    %c0_i32 = arith.constant 0 : i32
    %c0_i32_0 = arith.constant 0 : i32
    %c0_i32_1 = arith.constant 0 : i32
    return %c0_i32, %c0_i32_0 : i32, i32
  }
  func.func @transform_6(%arg0: i32) -> (i32, i32, i32) {
    %c0_i32 = arith.constant 0 : i32
    %c0_i32_0 = arith.constant 0 : i32
    %c0_i32_1 = arith.constant 0 : i32
    return %arg0, %c0_i32, %c0_i32_0 : i32, i32, i32
  }
}

</mosaic_0001>

<bundles_post_ra>
// kernel: tpu_custom_call.1
= control target key start
LH: loop header
LB: loop body
LE: loop exit
PB: predicated region body
PF: predicated region fallthrough
CT: control target
= control target key end

     0   :  { %11 = vsyncpa [#allocation3], 0  ;;  %s5701_s0 = inlined_call_operand.vmem [shape: f32[2,18,18,32], index: 0, kind: input, shape index: {}]   ;;  %s5702_s1 = inlined_call_operand.vmem [shape: bf16[9,32,128], index: 1, kind: input, shape index: {}]   ;;  %s5703_s2 = inlined_call_operand.vmem [shape: f32[1,128], index: 2, kind: input, shape index: {}]   ;;  %s5704_s3 = inlined_call_operand.vmem [shape: f32[1,128], index: 3, kind: input, shape index: {}]   ;;  %s5705_s4 = inlined_call_operand.vmem [shape: bf16[128,128], index: 4, kind: input, shape index: {}]   ;;  %s5706_s5 = inlined_call_operand.vmem [shape: f32[1,128], index: 5, kind: input, shape index: {}]   ;;  %s5707_s6 = inlined_call_operand.hbm [shape: f32[2,256,128], index: 6, kind: output, shape index: {}]  }
   0x1   :  { %13 = vsyncpa [#allocation3 + $0x1], 0  ;;  %s4802_s21 = smov 0   ;;  %s4804_s22 = smov 0  }
   0x2   :  { %s4806_s23 = smov 0   ;;  %s4808_s24 = smov 0  }
   0x3 LB: > { %s4823_s25 = sadd.s32 4294967295, %s4762_s24   ;;  %s3409_s26 = sadd.s32 4294967294, %s4762_s24   ;;  %s4762_s24 = sphi %s4808_s24, %s5713_s24   ;;  %s4758_s23 = sphi %s4806_s23, %s5712_s23   ;;  %s4754_s22 = sphi %s4804_s22, %s5711_s22   ;;  %s4750_s21 = sphi %s4802_s21, %s5710_s21  }
   0x4   : > { %s4827_s27 = sadd.s32 1, %s4762_s24   ;;  %s157_s28 = sadd.s32 1, %s4758_s23 }
   0x5   : > { %s154_s29 = ssub.s32 %s4762_s24, %s4827_s27  ;;  %p167_p0 = scmp.ne.s32.totalorder %s4758_s23, %s4754_s22 }
   0x6   : > { %p155_p1 = scmp.eq.s32.totalorder %s154_s29, 0  ;;  %p168_p2 = scmp.eq.s32.totalorder %s4823_s25, 1 }
   0x7   : > { %p173_p3 = scmp.ne.s32.totalorder %s4754_s22, %s4750_s21  ;;  %p174_p4 = scmp.eq.s32.totalorder %s3409_s26, 1 }
   0x8   : > { %s4838_s30 = scalar_select %p155_p1, %s4758_s23, %s157_s28  }
   0x9   : > { %p4840_p5 = por %p168_p2, %p167_p0  ;;  %p4844_p6 = por %p174_p4, %p173_p3 }
   0xa   : > { %p3412_p7 = scmp.ge.s32.totalorder %s4762_s24, 1  ;;  %p215_p8 = scmp.lt.s32.totalorder %s4762_s24, 3 }
   0xc   : > { %p216_p9 = pnand %p3412_p7, %p215_p8 }
   0xd   : > { %v4674_v0 = vld [vmem:[%s5702_s1 + $0x10] sm:$0xff] (!%p216_p9)   ;;  %p245_p10 = scmp.lt.s32.totalorder (!%p216_p9), %s4823_s25, 1  ;;  %v4675_v1 = vld [vmem:[%s5702_s1 + $0x40] sm:$0xff] (!%p216_p9)   ;;  %v4676_v2 = vld [vmem:[%s5702_s1 + $0x18] sm:$0xff] (!%p216_p9)   ;;  %vm368_vm0 = vcmask (!%p216_p9), 261120   ;;  %s242_s12 = sand.u32 (!%p216_p9), 1, %s4754_s22  }
   0xe   : > { %219 = sbr.rel (%p216_p9) target bundleno = 801 (0x321), region = 44  ;;  %4004 = vmatprep.subr.bf16.mxu1 (!%p216_p9), %v4674_v0  ;;  %4148 = vmatprep.subr.bf16.mxu0 (!%p216_p9), %v4675_v1  ;;  %v4677_v3 = vld [vmem:[%s5702_s1 + $0x48] sm:$0xff] (!%p216_p9)   ;;  %v4678_v4 = vld [vmem:[%s5702_s1 + $0x50] sm:$0xff] (!%p216_p9)   ;;  %v4680_v5 = vld [vmem:[%s5702_s1] sm:$0xff] (!%p216_p9)   ;;  %s3413_s13 = sshll.u32 (!%p216_p9), %s242_s12, 8 }
   0xf   : > { %4005 = vmatpush3.bf16.msra.mxu1 (!%p216_p9), %v4674_v0  ;;  %4149 = vmatpush3.bf16.msra.mxu0 (!%p216_p9), %v4675_v1  ;;  %v4679_v18 = vld [vmem:[%s5702_s1 + $0x58] sm:$0xff] (!%p216_p9)   ;;  %v4681_v25 = vld [vmem:[%s5702_s1 + $0x8] sm:$0xff] (!%p216_p9)   ;;  %v4925_v30 = vld [vmem:[%s5702_s1 + $0x60] sm:$0xff] (!%p216_p9)   ;;  %s5585_s16 = scalar_lea.vmem (!%p216_p9), [#allocation2], %s3413_s13  ;;  %s3817_s17 = sshll.u32 (!%p216_p9), %s4823_s25, 12 }
  0x10   : > { %4006 = vmatprep.subr.bf16.mxu1 (!%p216_p9), %v4676_v2  ;;  %4150 = vmatprep.subr.bf16.mxu0 (!%p216_p9), %v4677_v3  ;;  %v4967_v45 = vld [vmem:[%s5702_s1 + $0x20] sm:$0xff] (!%p216_p9)   ;;  %s5650_s20 = scalar_lea.hbm (!%p216_p9), %s5707_s6, %s3817_s17  ;;  %s4764_s28 = smov (!%p216_p9), [#allocation2]  }
  0x11   : > { %s4704_s9 = sshll.u32 (!%p216_p9), %s4764_s28, 4  ;;  %s4705_s9 = int_to_ptr.vmem [resolvable:$false] %s4704_s9 }
  0x12   : > { %s4706_s10 = scalar_lea.vmem (!%p216_p9), %s4705_s9, 8192 }
  0x13   : > { %4007 = vmatpush3.bf16.msra.mxu1 (!%p216_p9), %v4676_v2  ;;  %4151 = vmatpush3.bf16.msra.mxu0 (!%p216_p9), %v4677_v3 }
  0x14   : > { %4040 = vmatprep.subr.bf16.mxu1 (!%p216_p9), %v4680_v5  ;;  %4184 = vmatprep.subr.bf16.mxu0 (!%p216_p9), %v4678_v4 }
  0x15   : > { %s246_s15 = scalar_select %p245_p10, %s4823_s25, 1 }
  0x16   : > { %s5660_s25 = scalar_lea.sflag [#allocation3], %s242_s12 }
  0x17   : > { %s4632_s18 = smul.u32 432, %s246_s15 }
  0x19   : > { %s4870_s29 = scalar_lea.vmem %s5701_s0, %s4632_s18  ;;  %s3347_s18 = sshll.u32 %s5585_s16, 4  ;;  %s5652_s18 = int_to_ptr.vmem [resolvable:$true] %s3347_s18 }
  0x1a   : > { %v303_v6 = vld [vmem:[%s4870_s29 + $0x1] sm:$0xff]  ;;  %v304_v7 = vld [vmem:[%s4870_s29 + $0x9] sm:$0xff]  ;;  %v3531_v8 = vld [vmem:[%s4870_s29 + $0x19] sm:$0xff]  ;;  %s4700_s26 = scalar_lea.vmem %s5652_s18, 4096  ;;  %p4707_p0 = scmp.lt.s32.totalorder %s5652_s18, %s4705_s9 }
  0x1b   : > { %v335_v9 = vpack.c.bf16 %v304_v7, %v303_v6  ;;  %v3532_v10 = vld [vmem:[%s4870_s29 + $0x21] sm:$0xff]  ;;  %v3533_v11 = vld [vmem:[%s4870_s29 + $0x31] sm:$0xff]  ;;  %v3534_v12 = vld [vmem:[%s4870_s29 + $0x39] sm:$0xff]  ;;  %p4701_p11 = scmp.ne.s32.totalorder %s5652_s18, %s4700_s26  ;;  %p4708_p1 = scmp.lt.s32.totalorder %s4706_s10, %s4700_s26 }
  0x1c   : > { %v1444_v13 = vpack.c.bf16 %v3532_v10, %v3531_v8  ;;  %v4881_v14 = vpack.c.bf16 %v3534_v12, %v3533_v11  ;;  %v3535_v15 = vld [vmem:[%s4870_s29 + $0x49] sm:$0xff]  ;;  %v3536_v16 = vld [vmem:[%s4870_s29 + $0x51] sm:$0xff]  ;;  %v3537_v19 = vld [vmem:[%s4870_s29 + $0x61] sm:$0xff] }
  0x1d   : > { %4008 = vmatprep.mubr.msk.bf16.mxu1 %vm368_vm0, %v335_v9  ;;  %v4886_v17 = vpack.c.bf16 %v3536_v16, %v3535_v15  ;;  %v3538_v20 = vld [vmem:[%s4870_s29 + $0x69] sm:$0xff]  ;;  %v3539_v21 = vld [vmem:[%s4870_s29 + $0x79] sm:$0xff]  ;;  %v3540_v22 = vld [vmem:[%s4870_s29 + $0x81] sm:$0xff]  ;;  %p4702_p12 = pnand %p4701_p11, %p4840_p5  ;;  %p4709_p2 = por %p4708_p1, %p4707_p0 }
  0x1e   : > { %4152 = vmatprep.mubr.msk.bf16.mxu0 %vm368_vm0, %v1444_v13  ;;  %4009 = vmatmul.mubr.msk.bf16.vlgmr.msra.gmra.mrb[0].mxu1 %vm368_vm0, %v1444_v13  ;;  %v4903_v23 = vpack.c.bf16 %v3538_v20, %v3537_v19  ;;  %v4905_v24 = vpack.c.bf16 %v3540_v22, %v3539_v21  ;;  %v3541_v26 = vld [vmem:[%s4870_s29 + $0x91] sm:$0xff]  ;;  %v3542_v27 = vld [vmem:[%s4870_s29 + $0x99] sm:$0xff]  ;;  %v3543_v28 = vld [vmem:[%s4870_s29 + $0xa9] sm:$0xff] }
  0x1f   : > { %4153 = vmatmul.mubr.msk.bf16.vlgmr.msra.gmra.mrb[0].mxu0 %vm368_vm0, %v4881_v14  ;;  %4012 = vmatprep.mubr.msk.bf16.mxu1 %vm368_vm0, %v4881_v14  ;;  %v3544_v29 = vld [vmem:[%s4870_s29 + $0xb1] sm:$0xff]  ;;  %v4927_v31 = vpack.c.bf16 %v3542_v27, %v3541_v26  ;;  %v3545_v33 = vld [vmem:[%s4870_s29 + $0xc1] sm:$0xff]  ;;  %v3546_v34 = vld [vmem:[%s4870_s29 + $0xc9] sm:$0xff]  ;;  %p4703_p13 = pneg %p4702_p12 }
  0x20   : > { %4185 = vmatpush3.bf16.msra.mxu0 %v4678_v4  ;;  %4156 = vmatprep.mubr.msk.bf16.mxu0 %vm368_vm0, %v4886_v17  ;;  %v4930_v32 = vpack.c.bf16 %v3544_v29, %v3543_v28  ;;  %v3547_v35 = vld [vmem:[%s4870_s29 + $0xd9] sm:$0xff]  ;;  %v3548_v36 = vld [vmem:[%s4870_s29 + $0xe1] sm:$0xff]  ;;  %v4944_v37 = vpack.c.bf16 %v3546_v34, %v3545_v33  ;;  %v3549_v39 = vld [vmem:[%s4870_s29 + $0xf1] sm:$0xff] }
  0x21   : > { %4186 = vmatprep.subr.bf16.mxu0 %v4679_v18  ;;  %4041 = vmatpush3.bf16.msra.mxu1 %v4680_v5  ;;  %v4946_v38 = vpack.c.bf16 %v3548_v36, %v3547_v35  ;;  %v3550_v40 = vld [vmem:[%s4870_s29 + $0xf9] sm:$0xff]  ;;  %v3551_v41 = vld [vmem:[%s4870_s29 + $0x109] sm:$0xff]  ;;  %v3552_v42 = vld [vmem:[%s4870_s29 + $0x111] sm:$0xff]  ;;  %p4710_p3 = pnand %p4709_p2, %p4703_p13 }
  0x22   : > { %4042 = vmatprep.subr.bf16.mxu1 %v4681_v25  ;;  %v4960_v43 = vpack.c.bf16 %v3550_v40, %v3549_v39  ;;  %v4962_v44 = vpack.c.bf16 %v3552_v42, %v3551_v41  ;;  %v3553_v46 = vld [vmem:[%s4870_s29 + $0x121] sm:$0xff]  ;;  %v3554_v47 = vld [vmem:[%s4870_s29 + $0x129] sm:$0xff]  ;;  %v3555_v48 = vld [vmem:[%s4870_s29 + $0x139] sm:$0xff] }
  0x23   : > { %v3556_v49 = vld [vmem:[%s4870_s29 + $0x141] sm:$0xff]  ;;  %v4982_v50 = vpack.c.bf16 %v3554_v47, %v3553_v46  ;;  %v3557_v52 = vld [vmem:[%s4870_s29 + $0x151] sm:$0xff]  ;;  %v3558_v53 = vld [vmem:[%s4870_s29 + $0x159] sm:$0xff] }
  0x24   : > { %4187 = vmatpush3.bf16.msra.mxu0 %v4679_v18  ;;  %v4984_v51 = vpack.c.bf16 %v3556_v49, %v3555_v48  ;;  %v3559_v54 = vld [vmem:[%s4870_s29 + $0x169] sm:$0xff]  ;;  %v3560_v55 = vld [vmem:[%s4870_s29 + $0x171] sm:$0xff]  ;;  %v4998_v56 = vpack.c.bf16 %v3558_v53, %v3557_v52  ;;  %v3561_v58 = vld [vmem:[%s4870_s29 + $0x181] sm:$0xff] }
  0x25   : > { %4043 = vmatpush3.bf16.msra.mxu1 %v4681_v25  ;;  %4220 = vmatprep.subr.bf16.mxu0 %v4925_v30  ;;  %v5000_v57 = vpack.c.bf16 %v3560_v55, %v3559_v54  ;;  %v3562_v59 = vld [vmem:[%s4870_s29 + $0x189] sm:$0xff]  ;;  %v251_v60 = vld [vmem:[%s4870_s29] sm:$0xff]  ;;  %v253_v3 = vld [vmem:[%s4870_s29 + $0x18] sm:$0xff] }
  0x26   : > { %4013 = vmatmul.mubr.msk.bf16.gmra.mrb[4].mxu1 %vm368_vm0, %v4886_v17  ;;  %4076 = vmatprep.subr.bf16.mxu1 %v4967_v45  ;;  %v252_v61 = vld [vmem:[%s4870_s29 + $0x8] sm:$0xff]  ;;  %v3585_v62 = vld [vmem:[%s4870_s29 + $0x1a] sm:$0xff]  ;;  %v5016_v0 = vpack.c.bf16 %v3562_v59, %v3561_v58  ;;  %v3587_v5 = vld [vmem:[%s4870_s29 + $0x32] sm:$0xff] }
  0x27   : > { %4157 = vmatmul.mubr.msk.bf16.gmra.mrb[4].mxu0 %vm368_vm0, %v4903_v23  ;;  %4016 = vmatprep.mubr.msk.bf16.mxu1 %vm368_vm0, %v4903_v23  ;;  %v3586_v63 = vld [vmem:[%s4870_s29 + $0x22] sm:$0xff]  ;;  %v283_v1 = vpack.c.bf16 %v252_v61, %v251_v60  ;;  %v3588_v6 = vld [vmem:[%s4870_s29 + $0x3a] sm:$0xff]  ;;  %v255_v7 = vld [vmem:[%s4870_s29 + $0x30] sm:$0xff] }
  0x28   : > { %4160 = vmatprep.mubr.msk.bf16.mxu0 %vm368_vm0, %v4905_v24  ;;  %v5018_v2 = vpack.c.bf16 %v3586_v63, %v3585_v62  ;;  %v254_v4 = vld [vmem:[%s4870_s29 + $0x20] sm:$0xff]  ;;  %v256_v8 = vld [vmem:[%s4870_s29 + $0x38] sm:$0xff]  ;;  %v3589_v9 = vld [vmem:[%s4870_s29 + $0x4a] sm:$0xff]  ;;  %v5037_v12 = vpack.c.bf16 %v3588_v6, %v3587_v5 }
  0x29   : > { %v3590_v10 = vld [vmem:[%s4870_s29 + $0x52] sm:$0xff]  ;;  %v5035_v11 = vpack.c.bf16 %v254_v4, %v253_v3  ;;  %v5039_v13 = vpack.c.bf16 %v256_v8, %v255_v7  ;;  %v4683_v16 = vld [vmem:[%s5702_s1 + $0x68] sm:$0xff]   ;;  %v259_v25 = vld [vmem:[%s4870_s29 + $0x60] sm:$0xff] }
  0x2a   : > { %v5041_v15 = vpack.c.bf16 %v3590_v10, %v3589_v9  ;;  %v4685_v18 = vld [vmem:[%s5702_s1 + $0x28] sm:$0xff]   ;;  %v258_v20 = vld [vmem:[%s4870_s29 + $0x50] sm:$0xff]  ;;  %v3593_v27 = vld [vmem:[%s4870_s29 + $0x7a] sm:$0xff] }
  0x2b   : > { %v257_v19 = vld [vmem:[%s4870_s29 + $0x48] sm:$0xff]  ;;  %v5070_v29 = vld [vmem:[%s5702_s1 + $0x70] sm:$0xff]   ;;  %v261_v39 = vld [vmem:[%s4870_s29 + $0x78] sm:$0xff] }
  0x2c   : > { %v3591_v21 = vld [vmem:[%s4870_s29 + $0x62] sm:$0xff]  ;;  %v3592_v22 = vld [vmem:[%s4870_s29 + $0x6a] sm:$0xff]  ;;  %v3595_v41 = vld [vmem:[%s4870_s29 + $0x92] sm:$0xff] }
  0x2d   : > { %v260_v26 = vld [vmem:[%s4870_s29 + $0x68] sm:$0xff]  ;;  %v5077_v33 = vld [vmem:[%s5702_s1 + $0x30] sm:$0xff]   ;;  %v5079_v34 = vpack.c.bf16 %v3592_v22, %v3591_v21  ;;  %v262_v40 = vld [vmem:[%s4870_s29 + $0x80] sm:$0xff] }
  0x2e   : > { %4017 = vmatmul.mubr.msk.bf16.gmra.mrb[8].mxu1 %vm368_vm0, %v4905_v24  ;;  %v3594_v28 = vld [vmem:[%s4870_s29 + $0x82] sm:$0xff]  ;;  %v5081_v35 = vpack.c.bf16 %v260_v26, %v259_v25  ;;  %v3596_v42 = vld [vmem:[%s4870_s29 + $0x9a] sm:$0xff]  ;;  %v3597_v47 = vld [vmem:[%s4870_s29 + $0xaa] sm:$0xff]  ;;  %v5103_v49 = vpack.c.bf16 %v262_v40, %v261_v39 }
  0x2f   : > { %4161 = vmatmul.mubr.msk.bf16.gmra.mrb[8].mxu0 %vm368_vm0, %v4927_v31  ;;  %4020 = vmatprep.mubr.msk.bf16.mxu1 %vm368_vm0, %v4927_v31  ;;  %v5083_v36 = vpack.c.bf16 %v3594_v28, %v3593_v27  ;;  %v264_v46 = vld [vmem:[%s4870_s29 + $0x98] sm:$0xff]  ;;  %v5105_v52 = vpack.c.bf16 %v3596_v42, %v3595_v41  ;;  %v265_v55 = vld [vmem:[%s4870_s29 + $0xa8] sm:$0xff]  ;;  %v266_v58 = vld [vmem:[%s4870_s29 + $0xb0] sm:$0xff] }
  0x30   : > { %4164 = vmatprep.mubr.msk.bf16.mxu0 %vm368_vm0, %v4930_v32  ;;  %v3598_v48 = vld [vmem:[%s4870_s29 + $0xb2] sm:$0xff]  ;;  %v3599_v59 = vld [vmem:[%s4870_s29 + $0xc2] sm:$0xff]  ;;  %v3600_v60 = vld [vmem:[%s4870_s29 + $0xca] sm:$0xff]  ;;  %v5127_v3 = vpack.c.bf16 %v266_v58, %v265_v55 }
  0x31   : > { %v5109_v54 = vpack.c.bf16 %v3598_v48, %v3597_v47  ;;  %v267_v61 = vld [vmem:[%s4870_s29 + $0xc0] sm:$0xff]  ;;  %v268_v62 = vld [vmem:[%s4870_s29 + $0xc8] sm:$0xff]  ;;  %v5129_v4 = vpack.c.bf16 %v3600_v60, %v3599_v59  ;;  %v269_v7 = vld [vmem:[%s4870_s29 + $0xd8] sm:$0xff] }
  0x32   : > { %v3601_v63 = vld [vmem:[%s4870_s29 + $0xda] sm:$0xff]  ;;  %v5131_v5 = vpack.c.bf16 %v268_v62, %v267_v61  ;;  %v3603_v9 = vld [vmem:[%s4870_s29 + $0xf2] sm:$0xff]  ;;  %v273_v27 = vld [vmem:[%s4870_s29 + $0x108] sm:$0xff] }
  0x33   : > { %v270_v8 = vld [vmem:[%s4870_s29 + $0xe0] sm:$0xff]  ;;  %v274_v28 = vld [vmem:[%s4870_s29 + $0x110] sm:$0xff]  ;;  %v276_v42 = vld [vmem:[%s4870_s29 + $0x128] sm:$0xff] }
  0x34   : > { %v3604_v10 = vld [vmem:[%s4870_s29 + $0xfa] sm:$0xff]  ;;  %v5151_v21 = vpack.c.bf16 %v270_v8, %v269_v7  ;;  %v3607_v39 = vld [vmem:[%s4870_s29 + $0x122] sm:$0xff]  ;;  %v3608_v40 = vld [vmem:[%s4870_s29 + $0x12a] sm:$0xff]  ;;  %v5175_v47 = vpack.c.bf16 %v274_v28, %v273_v27 }
  0x35   : > { %v5153_v22 = vpack.c.bf16 %v3604_v10, %v3603_v9  ;;  %v275_v41 = vld [vmem:[%s4870_s29 + $0x120] sm:$0xff]  ;;  %v5177_v48 = vpack.c.bf16 %v3608_v40, %v3607_v39  ;;  %v277_v59 = vld [vmem:[%s4870_s29 + $0x138] sm:$0xff]  ;;  %v3613_v7 = vld [vmem:[%s4870_s29 + $0x16a] sm:$0xff] }
  0x36   : > { %4021 = vmatmul.mubr.msk.bf16.gmra.mrb[12].mxu1 %vm368_vm0, %v4930_v32  ;;  %v5179_v55 = vpack.c.bf16 %v276_v42, %v275_v41  ;;  %v278_v60 = vld [vmem:[%s4870_s29 + $0x140] sm:$0xff]  ;;  %v3611_v61 = vld [vmem:[%s4870_s29 + $0x152] sm:$0xff]  ;;  %v3616_v28 = vld [vmem:[%s4870_s29 + $0x18a] sm:$0xff] }
  0x37   : > { %4165 = vmatmul.mubr.msk.bf16.gmra.mrb[12].mxu0 %vm368_vm0, %v4944_v37  ;;  %4024 = vmatprep.mubr.msk.bf16.mxu1 %vm368_vm0, %v4944_v37  ;;  %v3612_v62 = vld [vmem:[%s4870_s29 + $0x15a] sm:$0xff]  ;;  %v3614_v8 = vld [vmem:[%s4870_s29 + $0x172] sm:$0xff]  ;;  %v5199_v9 = vpack.c.bf16 %v278_v60, %v277_v59  ;;  %v3615_v27 = vld [vmem:[%s4870_s29 + $0x182] sm:$0xff] }
  0x38   : > { %4168 = vmatprep.mubr.msk.bf16.mxu0 %vm368_vm0, %v4946_v38  ;;  %v5201_v10 = vpack.c.bf16 %v3612_v62, %v3611_v61  ;;  %v799_v39 = vld [vmem:[%s4870_s29 + $0x2] sm:$0xff]  ;;  %v800_v40 = vld [vmem:[%s4870_s29 + $0xa] sm:$0xff]  ;;  %v5223_v42 = vpack.c.bf16 %v3616_v28, %v3615_v27  ;;  %v4689_v59 = vld [vmem:[%s5702_s1 + $0x38] sm:$0xff]  }
  0x39   : > { %v3669_v61 = vld [vmem:[%s4870_s29 + $0x198] sm:$0xff]  ;;  %v3670_v62 = vld [vmem:[%s4870_s29 + $0x1a0] sm:$0xff] }
  0x3a   : > { %v5480_v27 = vld [vmem:[%s5703_s2] ss:$0 sm:$0xff] }
  0x3e   : > { %4025 = vmatmul.mubr.msk.bf16.gmra.mrb[16].mxu1 %vm368_vm0, %v4946_v38 }
  0x3f   : > { %4169 = vmatmul.mubr.msk.bf16.gmra.mrb[16].mxu0 %vm368_vm0, %v4960_v43  ;;  %4028 = vmatprep.mubr.msk.bf16.mxu1 %vm368_vm0, %v4960_v43 }
  0x40   : > { %4172 = vmatprep.mubr.msk.bf16.mxu0 %vm368_vm0, %v4962_v44 }
  0x46   : > { %4029 = vmatmul.mubr.msk.bf16.gmra.mrb[20].mxu1 %vm368_vm0, %v4962_v44 }
  0x47   : > { %4173 = vmatmul.mubr.msk.bf16.gmra.mrb[20].mxu0 %vm368_vm0, %v4982_v50  ;;  %4032 = vmatprep.mubr.msk.bf16.mxu1 %vm368_vm0, %v4982_v50 }
  0x48   : > { %4176 = vmatprep.mubr.msk.bf16.mxu0 %vm368_vm0, %v4984_v51 }
  0x4e   : > { %4033 = vmatmul.mubr.msk.bf16.gmra.mrb[24].mxu1 %vm368_vm0, %v4984_v51 }
  0x4f   : > { %4177 = vmatmul.mubr.msk.bf16.gmra.mrb[24].mxu0 %vm368_vm0, %v4998_v56  ;;  %4036 = vmatprep.mubr.msk.bf16.mxu1 %vm368_vm0, %v4998_v56 }
  0x50   : > { %4180 = vmatprep.mubr.msk.bf16.mxu0 %vm368_vm0, %v5000_v57 }
  0x56   : > { %4037 = vmatmul.mubr.msk.bf16.gmra.mrb[28].mxu1 %vm368_vm0, %v5000_v57 }
  0x57   : > { %4181 = vmatmul.mubr.msk.bf16.gmra.mrb[28].mxu0 %vm368_vm0, %v5016_v0  ;;  %4044 = vmatprep.mubr.msk.bf16.mxu1 %vm368_vm0, %v283_v1  ;;  %v3602_v1 = vld [vmem:[%s4870_s29 + $0xe2] sm:$0xff] }
  0x58   : > { %4188 = vmatprep.mubr.msk.bf16.mxu0 %vm368_vm0, %v5018_v2  ;;  %v5133_v6 = vpack.c.bf16 %v3602_v1, %v3601_v63  ;;  %v279_v63 = vld [vmem:[%s4870_s29 + $0x150] sm:$0xff]  ;;  %v280_v1 = vld [vmem:[%s4870_s29 + $0x158] sm:$0xff] }
  0x5e   : > { %4045 = vmatmul.mubr.msk.bf16.vlgmr.msra.gmra.mrb[0].mxu1 %vm368_vm0, %v5035_v11 }
  0x5f   : > { %4189 = vmatmul.mubr.msk.bf16.vlgmr.msra.gmra.mrb[0].mxu0 %vm368_vm0, %v5037_v12  ;;  %4048 = vmatprep.mubr.msk.bf16.mxu1 %vm368_vm0, %v5039_v13 }
  0x60   : > { %4221 = vmatpush3.bf16.msra.mxu0 %v4925_v30  ;;  %4192 = vmatprep.mubr.msk.bf16.mxu0 %vm368_vm0, %v5041_v15  ;;  %v5072_v30 = vpack.c.bf16 %v258_v20, %v257_v19  ;;  %v3605_v19 = vld [vmem:[%s4870_s29 + $0x10a] sm:$0xff]  ;;  %v3606_v20 = vld [vmem:[%s4870_s29 + $0x112] sm:$0xff] }
  0x61   : > { %4222 = vmatprep.subr.bf16.mxu0 %v4683_v16  ;;  %4077 = vmatpush3.bf16.msra.mxu1 %v4967_v45  ;;  %v263_v45 = vld [vmem:[%s4870_s29 + $0x90] sm:$0xff]  ;;  %v5157_v26 = vpack.c.bf16 %v3606_v20, %v3605_v19  ;;  %v281_v19 = vld [vmem:[%s4870_s29 + $0x168] sm:$0xff] }
  0x62   : > { %4078 = vmatprep.subr.bf16.mxu1 %v4685_v18  ;;  %v5107_v53 = vpack.c.bf16 %v264_v46, %v263_v45  ;;  %v3609_v45 = vld [vmem:[%s4870_s29 + $0x13a] sm:$0xff]  ;;  %v3610_v46 = vld [vmem:[%s4870_s29 + $0x142] sm:$0xff]  ;;  %v282_v20 = vld [vmem:[%s4870_s29 + $0x170] sm:$0xff] }
  0x63   : > { %v5181_v58 = vpack.c.bf16 %v3610_v46, %v3609_v45  ;;  %v5221_v41 = vpack.c.bf16 %v282_v20, %v281_v19  ;;  %v831_v45 = vpack.c.bf16 %v800_v40, %v799_v39  ;;  %v4687_v46 = vld [vmem:[%s5702_s1 + $0x78] sm:$0xff]   ;;  %v5485_v40 = vld [vmem:[%s5704_s3] ss:$0 sm:$0xff] }
  0x64   : > { %4223 = vmatpush3.bf16.msra.mxu0 %v4683_v16  ;;  %v271_v16 = vld [vmem:[%s4870_s29 + $0xf0] sm:$0xff] }
  0x65   : > { %4079 = vmatpush3.bf16.msra.mxu1 %v4685_v18  ;;  %4256 = vmatprep.subr.bf16.mxu0 %v5070_v29  ;;  %v272_v18 = vld [vmem:[%s4870_s29 + $0xf8] sm:$0xff] }
  0x66   : > { %4049 = vmatmul.mubr.msk.bf16.gmra.mrb[4].mxu1 %vm368_vm0, %v5072_v30  ;;  %4112 = vmatprep.subr.bf16.mxu1 %v5077_v33  ;;  %v5155_v25 = vpack.c.bf16 %v272_v18, %v271_v16  ;;  %v5203_v16 = vpack.c.bf16 %v280_v1, %v279_v63  ;;  %v5205_v18 = vpack.c.bf16 %v3614_v8, %v3613_v7  ;;  %v4691_v1 = vld [vmem:[%s5702_s1 + $0x88] sm:$0xff]  }
  0x67   : > { %4193 = vmatmul.mubr.msk.bf16.gmra.mrb[4].mxu0 %vm368_vm0, %v5079_v34  ;;  %4052 = vmatprep.mubr.msk.bf16.mxu1 %vm368_vm0, %v5081_v35  ;;  %v2072_v63 = vpack.c.bf16 %v3670_v62, %v3669_v61 }
  0x68   : > { %4196 = vmatprep.mubr.msk.bf16.mxu0 %vm368_vm0, %v5083_v36 }
  0x6e   : > { %4053 = vmatmul.mubr.msk.bf16.gmra.mrb[8].mxu1 %vm368_vm0, %v5103_v49 }
  0x6f   : > { %4197 = vmatmul.mubr.msk.bf16.gmra.mrb[8].mxu0 %vm368_vm0, %v5105_v52  ;;  %4056 = vmatprep.mubr.msk.bf16.mxu1 %vm368_vm0, %v5107_v53 }
  0x70   : > { %4200 = vmatprep.mubr.msk.bf16.mxu0 %vm368_vm0, %v5109_v54 }
  0x76   : > { %4057 = vmatmul.mubr.msk.bf16.gmra.mrb[12].mxu1 %vm368_vm0, %v5127_v3 }
  0x77   : > { %4201 = vmatmul.mubr.msk.bf16.gmra.mrb[12].mxu0 %vm368_vm0, %v5129_v4  ;;  %4060 = vmatprep.mubr.msk.bf16.mxu1 %vm368_vm0, %v5131_v5 }
  0x78   : > { %4204 = vmatprep.mubr.msk.bf16.mxu0 %vm368_vm0, %v5133_v6 }
  0x7e   : > { %4061 = vmatmul.mubr.msk.bf16.gmra.mrb[16].mxu1 %vm368_vm0, %v5151_v21 }
  0x7f   : > { %4205 = vmatmul.mubr.msk.bf16.gmra.mrb[16].mxu0 %vm368_vm0, %v5153_v22  ;;  %4064 = vmatprep.mubr.msk.bf16.mxu1 %vm368_vm0, %v5155_v25 }
  0x80   : > { %4208 = vmatprep.mubr.msk.bf16.mxu0 %vm368_vm0, %v5157_v26 }
  0x86   : > { %4065 = vmatmul.mubr.msk.bf16.gmra.mrb[20].mxu1 %vm368_vm0, %v5175_v47 }
  0x87   : > { %4209 = vmatmul.mubr.msk.bf16.gmra.mrb[20].mxu0 %vm368_vm0, %v5177_v48  ;;  %4068 = vmatprep.mubr.msk.bf16.mxu1 %vm368_vm0, %v5179_v55 }
  0x88   : > { %4212 = vmatprep.mubr.msk.bf16.mxu0 %vm368_vm0, %v5181_v58 }
  0x8e   : > { %4069 = vmatmul.mubr.msk.bf16.gmra.mrb[24].mxu1 %vm368_vm0, %v5199_v9 }
  0x8f   : > { %4213 = vmatmul.mubr.msk.bf16.gmra.mrb[24].mxu0 %vm368_vm0, %v5201_v10  ;;  %4072 = vmatprep.mubr.msk.bf16.mxu1 %vm368_vm0, %v5203_v16 }
  0x90   : > { %4216 = vmatprep.mubr.msk.bf16.mxu0 %vm368_vm0, %v5205_v18 }
  0x96   : > { %4073 = vmatmul.mubr.msk.bf16.gmra.mrb[28].mxu1 %vm368_vm0, %v5221_v41 }
  0x97   : > { %4217 = vmatmul.mubr.msk.bf16.gmra.mrb[28].mxu0 %vm368_vm0, %v5223_v42  ;;  %4080 = vmatprep.mubr.msk.bf16.mxu1 %vm368_vm0, %v831_v45 }
  0x98   : > { %4224 = vmatprep.mubr.msk.bf16.mxu0 %vm368_vm0, %v5039_v13 }
  0x9e   : > { %4081 = vmatmul.mubr.msk.bf16.vlgmr.msra.gmra.mrb[0].mxu1 %vm368_vm0, %v5018_v2  ;;  %v4690_v2 = vld [vmem:[%s5702_s1 + $0x80] sm:$0xff]  }
  0x9f   : > { %4225 = vmatmul.mubr.msk.bf16.vlgmr.msra.gmra.mrb[0].mxu0 %vm368_vm0, %v5072_v30  ;;  %4084 = vmatprep.mubr.msk.bf16.mxu1 %vm368_vm0, %v5037_v12 }
  0xa0   : > { %4257 = vmatpush3.bf16.msra.mxu0 %v5070_v29  ;;  %4228 = vmatprep.mubr.msk.bf16.mxu0 %vm368_vm0, %v5081_v35  ;;  %v3667_v29 = vld [vmem:[%s4870_s29 + $0x180] sm:$0xff] }
  0xa1   : > { %4258 = vmatprep.subr.bf16.mxu0 %v4687_v46  ;;  %4113 = vmatpush3.bf16.msra.mxu1 %v5077_v33  ;;  %v3668_v33 = vld [vmem:[%s4870_s29 + $0x188] sm:$0xff] }
  0xa2   : > { %4114 = vmatprep.subr.bf16.mxu1 %v4689_v59  ;;  %v2071_v60 = vpack.c.bf16 %v3668_v33, %v3667_v29 }
  0xa4   : > { %4259 = vmatpush3.bf16.msra.mxu0 %v4687_v46 }
  0xa5   : > { %4115 = vmatpush3.bf16.msra.mxu1 %v4689_v59  ;;  %4292 = vmatprep.subr.bf16.mxu0 %v4690_v2 }
  0xa6   : > { %4085 = vmatmul.mubr.msk.bf16.gmra.mrb[4].mxu1 %vm368_vm0, %v5041_v15 }
  0xa7   : > { %4229 = vmatmul.mubr.msk.bf16.gmra.mrb[4].mxu0 %vm368_vm0, %v5103_v49  ;;  %4088 = vmatprep.mubr.msk.bf16.mxu1 %vm368_vm0, %v5079_v34 }
  0xa8   : > { %4232 = vmatprep.mubr.msk.bf16.mxu0 %vm368_vm0, %v5107_v53 }
  0xae   : > { %4089 = vmatmul.mubr.msk.bf16.gmra.mrb[8].mxu1 %vm368_vm0, %v5083_v36 }
  0xaf   : > { %4233 = vmatmul.mubr.msk.bf16.gmra.mrb[8].mxu0 %vm368_vm0, %v5127_v3  ;;  %4092 = vmatprep.mubr.msk.bf16.mxu1 %vm368_vm0, %v5105_v52 }
  0xb0   : > { %4236 = vmatprep.mubr.msk.bf16.mxu0 %vm368_vm0, %v5131_v5 }
  0xb6   : > { %4093 = vmatmul.mubr.msk.bf16.gmra.mrb[12].mxu1 %vm368_vm0, %v5109_v54 }
  0xb7   : > { %4237 = vmatmul.mubr.msk.bf16.gmra.mrb[12].mxu0 %vm368_vm0, %v5151_v21  ;;  %4096 = vmatprep.mubr.msk.bf16.mxu1 %vm368_vm0, %v5129_v4 }
  0xb8   : > { %4240 = vmatprep.mubr.msk.bf16.mxu0 %vm368_vm0, %v5155_v25 }
  0xbe   : > { %4097 = vmatmul.mubr.msk.bf16.gmra.mrb[16].mxu1 %vm368_vm0, %v5133_v6 }
  0xbf   : > { %4241 = vmatmul.mubr.msk.bf16.gmra.mrb[16].mxu0 %vm368_vm0, %v5175_v47  ;;  %4100 = vmatprep.mubr.msk.bf16.mxu1 %vm368_vm0, %v5153_v22 }
  0xc0   : > { %4244 = vmatprep.mubr.msk.bf16.mxu0 %vm368_vm0, %v5179_v55 }
  0xc6   : > { %4101 = vmatmul.mubr.msk.bf16.gmra.mrb[20].mxu1 %vm368_vm0, %v5157_v26 }
  0xc7   : > { %4245 = vmatmul.mubr.msk.bf16.gmra.mrb[20].mxu0 %vm368_vm0, %v5199_v9  ;;  %4104 = vmatprep.mubr.msk.bf16.mxu1 %vm368_vm0, %v5177_v48 }
  0xc8   : > { %4248 = vmatprep.mubr.msk.bf16.mxu0 %vm368_vm0, %v5203_v16 }
  0xce   : > { %4105 = vmatmul.mubr.msk.bf16.gmra.mrb[24].mxu1 %vm368_vm0, %v5181_v58 }
  0xcf   : > { %4249 = vmatmul.mubr.msk.bf16.gmra.mrb[24].mxu0 %vm368_vm0, %v5221_v41  ;;  %4108 = vmatprep.mubr.msk.bf16.mxu1 %vm368_vm0, %v5201_v10 }
  0xd0   : > { %4252 = vmatprep.mubr.msk.bf16.mxu0 %vm368_vm0, %v2071_v60 }
  0xd6   : > { %4109 = vmatmul.mubr.msk.bf16.gmra.mrb[28].mxu1 %vm368_vm0, %v5205_v18 }
  0xd7   : > { %4253 = vmatmul.mubr.msk.bf16.gmra.mrb[28].mxu0 %vm368_vm0, %v2072_v63  ;;  %4116 = vmatprep.mubr.msk.bf16.mxu1 %vm368_vm0, %v5035_v11 }
  0xd8   : > { %4260 = vmatprep.mubr.msk.bf16.mxu0 %vm368_vm0, %v4881_v14  ;;  %v3723_v14 = vld [vmem:[%s4870_s29 + $0x199] sm:$0xff] }
  0xde   : > { %4117 = vmatmul.mubr.msk.bf16.vlgmr.msra.gmra.mrb[0].mxu1 %vm368_vm0, %v5039_v13 }
  0xdf   : > { %4261 = vmatmul.mubr.msk.bf16.vlgmr.msra.gmra.mrb[0].mxu0 %vm368_vm0, %v4886_v17  ;;  %4120 = vmatprep.mubr.msk.bf16.mxu1 %vm368_vm0, %v5072_v30  ;;  %v3724_v17 = vld [vmem:[%s4870_s29 + $0x1a1] sm:$0xff] }
  0xe0   : > { %4293 = vmatpush3.bf16.msra.mxu0 %v4690_v2  ;;  %4264 = vmatprep.mubr.msk.bf16.mxu0 %vm368_vm0, %v4903_v23  ;;  %v2378_v23 = vpack.c.bf16 %v3724_v17, %v3723_v14 }
  0xe1   : > { %4294 = vmatprep.subr.bf16.mxu0 %v4691_v1 }
  0xe4   : > { %4295 = vmatpush3.bf16.msra.mxu0 %v4691_v1 }
  0xe6   : > { %4121 = vmatmul.mubr.msk.bf16.gmra.mrb[4].mxu1 %vm368_vm0, %v5081_v35 }
  0xe7   : > { %4265 = vmatmul.mubr.msk.bf16.gmra.mrb[4].mxu0 %vm368_vm0, %v4905_v24  ;;  %4124 = vmatprep.mubr.msk.bf16.mxu1 %vm368_vm0, %v5103_v49  ;;  %v4692_v24 = vld [vmem:[%s5705_s4] sm:$0xff]  }
  0xe8   : > { %4268 = vmatprep.mubr.msk.bf16.mxu0 %vm368_vm0, %v4927_v31  ;;  %4328 = vmatprep.subr.bf16.mxu1 %v4692_v24  ;;  %v4693_v31 = vld [vmem:[%s5705_s4 + $0x8] sm:$0xff]  }
  0xe9   : > { %4329 = vmatpush3.bf16.msra.mxu1 %v4692_v24 }
  0xea   : > { %4330 = vmatprep.subr.bf16.mxu1 %v4693_v31 }
  0xed   : > { %4331 = vmatpush3.bf16.msra.mxu1 %v4693_v31 }
  0xee   : > { %4125 = vmatmul.mubr.msk.bf16.gmra.mrb[8].mxu1 %vm368_vm0, %v5107_v53 }
  0xef   : > { %4269 = vmatmul.mubr.msk.bf16.gmra.mrb[8].mxu0 %vm368_vm0, %v4930_v32  ;;  %4128 = vmatprep.mubr.msk.bf16.mxu1 %vm368_vm0, %v5127_v3  ;;  %v4694_v32 = vld [vmem:[%s5705_s4 + $0x10] sm:$0xff]  }
  0xf0   : > { %4272 = vmatprep.mubr.msk.bf16.mxu0 %vm368_vm0, %v4944_v37  ;;  %4332 = vmatprep.subr.bf16.mxu1 %v4694_v32  ;;  %v3777_v37 = vld [vmem:[%s4870_s29 + $0x19a] sm:$0xff] }
  0xf1   : > { %4333 = vmatpush3.bf16.msra.mxu1 %v4694_v32 }
  0xf6   : > { %4129 = vmatmul.mubr.msk.bf16.gmra.mrb[12].mxu1 %vm368_vm0, %v5131_v5 }
  0xf7   : > { %4273 = vmatmul.mubr.msk.bf16.gmra.mrb[12].mxu0 %vm368_vm0, %v4946_v38  ;;  %4132 = vmatprep.mubr.msk.bf16.mxu1 %vm368_vm0, %v5151_v21  ;;  %v3778_v38 = vld [vmem:[%s4870_s29 + $0x1a2] sm:$0xff] }
  0xf8   : > { %4276 = vmatprep.mubr.msk.bf16.mxu0 %vm368_vm0, %v4960_v43  ;;  %v2684_v43 = vpack.c.bf16 %v3778_v38, %v3777_v37 }
  0xfe   : > { %4133 = vmatmul.mubr.msk.bf16.gmra.mrb[16].mxu1 %vm368_vm0, %v5155_v25 }
  0xff   : > { %4277 = vmatmul.mubr.msk.bf16.gmra.mrb[16].mxu0 %vm368_vm0, %v4962_v44  ;;  %4136 = vmatprep.mubr.msk.bf16.mxu1 %vm368_vm0, %v5175_v47  ;;  %v4695_v44 = vld [vmem:[%s5705_s4 + $0x18] sm:$0xff]  }
 0x100   : > { %4280 = vmatprep.mubr.msk.bf16.mxu0 %vm368_vm0, %v4982_v50  ;;  %4334 = vmatprep.subr.bf16.mxu1 %v4695_v44  ;;  %v4696_v50 = vld [vmem:[%s5705_s4 + $0x20] sm:$0xff]  }
 0x101   : > { %4335 = vmatpush3.bf16.msra.mxu1 %v4695_v44 }
 0x102   : > { %4336 = vmatprep.subr.bf16.mxu1 %v4696_v50 }
 0x105   : > { %4337 = vmatpush3.bf16.msra.mxu1 %v4696_v50 }
 0x106   : > { %4137 = vmatmul.mubr.msk.bf16.gmra.mrb[20].mxu1 %vm368_vm0, %v5179_v55 }
 0x107   : > { %4281 = vmatmul.mubr.msk.bf16.gmra.mrb[20].mxu0 %vm368_vm0, %v4984_v51  ;;  %4140 = vmatprep.mubr.msk.bf16.mxu1 %vm368_vm0, %v5199_v9  ;;  %v4697_v51 = vld [vmem:[%s5705_s4 + $0x28] sm:$0xff]  }
 0x108   : > { %4284 = vmatprep.mubr.msk.bf16.mxu0 %vm368_vm0, %v4998_v56  ;;  %4338 = vmatprep.subr.bf16.mxu1 %v4697_v51  ;;  %v4698_v56 = vld [vmem:[%s5705_s4 + $0x30] sm:$0xff]  }
 0x109   : > { %4339 = vmatpush3.bf16.msra.mxu1 %v4697_v51 }
 0x10a   : > { %4340 = vmatprep.subr.bf16.mxu1 %v4698_v56 }
 0x10d   : > { %4341 = vmatpush3.bf16.msra.mxu1 %v4698_v56 }
 0x10e   : > { %4141 = vmatmul.mubr.msk.bf16.gmra.mrb[24].mxu1 %vm368_vm0, %v5203_v16 }
 0x10f   : > { %4285 = vmatmul.mubr.msk.bf16.gmra.mrb[24].mxu0 %vm368_vm0, %v5000_v57  ;;  %4144 = vmatprep.mubr.msk.bf16.mxu1 %vm368_vm0, %v5221_v41  ;;  %v4699_v57 = vld [vmem:[%s5705_s4 + $0x38] sm:$0xff]  }
 0x110   : > { %4288 = vmatprep.mubr.msk.bf16.mxu0 %vm368_vm0, %v5016_v0  ;;  %4342 = vmatprep.subr.bf16.mxu1 %v4699_v57 }
 0x111   : > { %4343 = vmatpush3.bf16.msra.mxu1 %v4699_v57 }
 0x116   : > { %4145 = vmatmul.mubr.msk.bf16.gmra.mrb[28].mxu1 %vm368_vm0, %v2071_v60 }
 0x117   : > { %4289 = vmatmul.mubr.msk.bf16.gmra.mrb[28].mxu0 %vm368_vm0, %v2378_v23 }
 0x118   : > { %4296 = vmatprep.mubr.msk.bf16.mxu0 %vm368_vm0, %v5037_v12 }
 0x11f   : > { %4297 = vmatmul.mubr.msk.bf16.vlgmr.msra.gmra.mrb[0].mxu0 %vm368_vm0, %v5041_v15 }
 0x120   : > { %4300 = vmatprep.mubr.msk.bf16.mxu0 %vm368_vm0, %v5079_v34 }
 0x127   : > { %4301 = vmatmul.mubr.msk.bf16.gmra.mrb[4].mxu0 %vm368_vm0, %v5083_v36 }
 0x128   : > { %4304 = vmatprep.mubr.msk.bf16.mxu0 %vm368_vm0, %v5105_v52 }
 0x12f   : > { %4305 = vmatmul.mubr.msk.bf16.gmra.mrb[8].mxu0 %vm368_vm0, %v5109_v54 }
 0x130   : > { %4308 = vmatprep.mubr.msk.bf16.mxu0 %vm368_vm0, %v5129_v4 }
 0x137   : > { %4309 = vmatmul.mubr.msk.bf16.gmra.mrb[12].mxu0 %vm368_vm0, %v5133_v6 }
 0x138   : > { %4312 = vmatprep.mubr.msk.bf16.mxu0 %vm368_vm0, %v5153_v22 }
 0x13f   : > { %4313 = vmatmul.mubr.msk.bf16.gmra.mrb[16].mxu0 %vm368_vm0, %v5157_v26 }
 0x140   : > { %4316 = vmatprep.mubr.msk.bf16.mxu0 %vm368_vm0, %v5177_v48 }
 0x147   : > { %4317 = vmatmul.mubr.msk.bf16.gmra.mrb[20].mxu0 %vm368_vm0, %v5181_v58 }
 0x148   : > { %4320 = vmatprep.mubr.msk.bf16.mxu0 %vm368_vm0, %v5201_v10 }
 0x14f   : > { %4321 = vmatmul.mubr.msk.bf16.gmra.mrb[24].mxu0 %vm368_vm0, %v5205_v18 }
 0x150   : > { %4324 = vmatprep.mubr.msk.bf16.mxu0 %vm368_vm0, %v5223_v42 }
 0x157   : > { %4325 = vmatmul.mubr.msk.bf16.gmra.mrb[28].mxu0 %vm368_vm0, %v2684_v43 }
 0x1b1   : > { %v4118_v0 = vpop.f32.mrb[0].mxu1 }
 0x1b2   : > { %v1253_v11 = vpop.f32.mrb[1].mxu1 }
 0x1b3   : > { %v4119_v12 = vpop.f32.mrb[2].mxu1 }
 0x1b4   : > { %v1256_v13 = vpop.f32.mrb[3].mxu1 }
 0x1b9   : > { %v4122_v15 = vpop.f32.mrb[4].mxu1 }
 0x1ba   : > { %v1269_v30 = vpop.f32.mrb[5].mxu1 }
 0x1bb   : > { %v4123_v34 = vpop.f32.mrb[6].mxu1 }
 0x1bc   : > { %v1272_v35 = vpop.f32.mrb[7].mxu1 }
 0x1c1   : > { %v5429_v36 = vpop.f32.mrb[8].mxu1 }
 0x1c2   : > { %v5431_v49 = vpop.f32.mrb[9].mxu1 }
 0x1c3   : > { %v5433_v52 = vpop.f32.mrb[10].mxu1 }
 0x1c4   : > { %v5435_v53 = vpop.f32.mrb[11].mxu1 }
 0x1c9   : > { %v5437_v54 = vpop.f32.mrb[12].mxu1 }
 0x1ca   : > { %v5439_v3 = vpop.f32.mrb[13].mxu1 }
 0x1cb   : > { %v5441_v4 = vpop.f32.mrb[14].mxu1 }
 0x1cc   : > { %v5443_v5 = vpop.f32.mrb[15].mxu1 }
 0x1d1   : > { %v5445_v6 = vpop.f32.mrb[16].mxu1 }
 0x1d2   : > { %v5447_v21 = vpop.f32.mrb[17].mxu1 }
 0x1d3   : > { %v5449_v22 = vpop.f32.mrb[18].mxu1 }
 0x1d4   : > { %v5451_v25 = vpop.f32.mrb[19].mxu1 }
 0x1d9   : > { %v5453_v26 = vpop.f32.mrb[20].mxu1 }
 0x1da   : > { %v5455_v47 = vpop.f32.mrb[21].mxu1 }
 0x1db   : > { %v5457_v48 = vpop.f32.mrb[22].mxu1 }
 0x1dc   : > { %v5459_v55 = vpop.f32.mrb[23].mxu1 }
 0x1e1   : > { %v5461_v58 = vpop.f32.mrb[24].mxu1 }
 0x1e2   : > { %v5463_v7 = vpop.f32.mrb[25].mxu1 }
 0x1e3   : > { %v5465_v8 = vpop.f32.mrb[26].mxu1 }
 0x1e4   : > { %v5467_v9 = vpop.f32.mrb[27].mxu1 }
 0x1e9   : > { %v5469_v10 = vpop.f32.mrb[28].mxu1 }
 0x1ea   : > { %v5471_v16 = vpop.f32.mrb[29].mxu1 }
 0x1eb   : > { %v5473_v18 = vpop.f32.mrb[30].mxu1 }
 0x1ec   : > { %v5475_v19 = vpop.f32.mrb[31].mxu1 }
 0x1f2   : > { %v4298_v20 = vpop.f32.mrb[0].mxu0 }
 0x1f3   : > { %v4376_v28 = vadd.f32 %v4298_v20, %v4118_v0  ;;  %v2784_v39 = vpop.f32.mrb[1].mxu0 }
 0x1f4   : > { %v4377_v41 = vadd.f32 %v2784_v39, %v1253_v11  ;;  %v4299_v42 = vpop.f32.mrb[2].mxu0 }
 0x1f5   : > { %v2952_v45 = vmul.f32 %v4376_v28, %v5480_v27  ;;  %v4378_v46 = vadd.f32 %v4299_v42, %v4119_v12  ;;  %v2787_v59 = vpop.f32.mrb[3].mxu0 }
 0x1f6   : > { %v2950_v2 = vmul.f32 %v4377_v41, %v5480_v27  ;;  %v4379_v29 = vadd.f32 %v2787_v59, %v1256_v13 }
 0x1f7   : > { %v2991_v33 = vadd.f32 %v5485_v40, %v2952_v45  ;;  %v2953_v60 = vmul.f32 %v4378_v46, %v5480_v27 }
 0x1f8   : > { %v2989_v61 = vadd.f32 %v5485_v40, %v2950_v2  ;;  %v2951_v62 = vmul.f32 %v4379_v29, %v5480_v27 }
 0x1f9   : > { %v2992_v63 = vadd.f32 %v5485_v40, %v2953_v60  ;;  %v3023_v17 = vmax.f32 %v2991_v33, 0.0 }
 0x1fa   : > { %v2990_v1 = vadd.f32 %v5485_v40, %v2951_v62  ;;  %v4302_v14 = vpop.f32.mrb[4].mxu0  ;;  %v3021_v32 = vmax.f32 %v2989_v61, 0.0 }
 0x1fb   : > { %v3024_v23 = vmax.f32 %v2992_v63, 0.0  ;;  %v4380_v24 = vadd.f32 %v4302_v14, %v4122_v15  ;;  %v2800_v31 = vpop.f32.mrb[5].mxu0 }
 0x1fc   : > { %v3022_v37 = vmax.f32 %v2990_v1, 0.0  ;;  %v4381_v38 = vadd.f32 %v2800_v31, %v1269_v30  ;;  %v4303_v43 = vpop.f32.mrb[6].mxu0 }
 0x1fd   : > { %v3054_v44 = vpack.c.bf16 %v3024_v23, %v3023_v17  ;;  %v2956_v50 = vmul.f32 %v4380_v24, %v5480_v27  ;;  %v4382_v51 = vadd.f32 %v4303_v43, %v4123_v34  ;;  %v2803_v56 = vpop.f32.mrb[7].mxu0 }
 0x1fe   : > { %v2954_v57 = vmul.f32 %v4381_v38, %v5480_v27  ;;  %v4383_v0 = vadd.f32 %v2803_v56, %v1272_v35  ;;  %v3053_v11 = vpack.c.bf16 %v3022_v37, %v3021_v32 }
 0x1ff   : > { %v2995_v12 = vadd.f32 %v5485_v40, %v2956_v50  ;;  %v2957_v13 = vmul.f32 %v4382_v51, %v5480_v27 }
 0x200   : > { %v2993_v15 = vadd.f32 %v5485_v40, %v2954_v57  ;;  %v2955_v20 = vmul.f32 %v4383_v0, %v5480_v27  ;;  %4344 = vmatprep.mubr.bf16.mxu1 %v3053_v11 }
 0x201   : > { %v2996_v30 = vadd.f32 %v5485_v40, %v2957_v13  ;;  %4345 = vmatmul.mubr.bf16.vlgmr.msra.gmra.mrb[32].mxu1 %v3054_v44  ;;  %v3027_v39 = vmax.f32 %v2995_v12, 0.0 }
 0x202   : > { %v2994_v28 = vadd.f32 %v5485_v40, %v2955_v20  ;;  %v4306_v34 = vpop.f32.mrb[8].mxu0  ;;  %v3025_v45 = vmax.f32 %v2993_v15, 0.0 }
 0x203   : > { %v3028_v41 = vmax.f32 %v2996_v30, 0.0  ;;  %v4384_v35 = vadd.f32 %v4306_v34, %v5429_v36  ;;  %v2816_v42 = vpop.f32.mrb[9].mxu0 }
 0x204   : > { %v3026_v46 = vmax.f32 %v2994_v28, 0.0  ;;  %v4385_v59 = vadd.f32 %v2816_v42, %v5431_v49  ;;  %v4307_v2 = vpop.f32.mrb[10].mxu0 }
 0x205   : > { %v2960_v29 = vmul.f32 %v4384_v35, %v5480_v27  ;;  %v4386_v33 = vadd.f32 %v4307_v2, %v5433_v52  ;;  %v2819_v60 = vpop.f32.mrb[11].mxu0  ;;  %v3056_v61 = vpack.c.bf16 %v3028_v41, %v3027_v39 }
 0x206   : > { %v2958_v62 = vmul.f32 %v4385_v59, %v5480_v27  ;;  %v4387_v63 = vadd.f32 %v2819_v60, %v5435_v53  ;;  %v3055_v1 = vpack.c.bf16 %v3026_v46, %v3025_v45 }
 0x207   : > { %v2999_v14 = vadd.f32 %v5485_v40, %v2960_v29  ;;  %v2961_v36 = vmul.f32 %v4386_v33, %v5480_v27 }
 0x208   : > { %v2997_v17 = vadd.f32 %v5485_v40, %v2958_v62  ;;  %v2959_v49 = vmul.f32 %v4387_v63, %v5480_v27  ;;  %4348 = vmatprep.mubr.bf16.mxu1 %v3055_v1 }
 0x209   : > { %v3000_v23 = vadd.f32 %v5485_v40, %v2961_v36  ;;  %4349 = vmatmul.mubr.bf16.gmra.mrb[36].mxu1 %v3056_v61  ;;  %v3031_v31 = vmax.f32 %v2999_v14, 0.0 }
 0x20a   : > { %v2998_v52 = vadd.f32 %v5485_v40, %v2959_v49  ;;  %v4310_v24 = vpop.f32.mrb[12].mxu0  ;;  %v3029_v38 = vmax.f32 %v2997_v17, 0.0 }
 0x20b   : > { %v3032_v32 = vmax.f32 %v3000_v23, 0.0  ;;  %v4388_v53 = vadd.f32 %v4310_v24, %v5437_v54  ;;  %v2832_v37 = vpop.f32.mrb[13].mxu0 }
 0x20c   : > { %v3030_v43 = vmax.f32 %v2998_v52, 0.0  ;;  %v4389_v44 = vadd.f32 %v2832_v37, %v5439_v3  ;;  %v4311_v50 = vpop.f32.mrb[14].mxu0 }
 0x20d   : > { %v2964_v51 = vmul.f32 %v4388_v53, %v5480_v27  ;;  %v4390_v56 = vadd.f32 %v4311_v50, %v5441_v4  ;;  %v2835_v57 = vpop.f32.mrb[15].mxu0  ;;  %v3058_v0 = vpack.c.bf16 %v3032_v32, %v3031_v31 }
 0x20e   : > { %v2962_v11 = vmul.f32 %v4389_v44, %v5480_v27  ;;  %v4391_v12 = vadd.f32 %v2835_v57, %v5443_v5  ;;  %v3057_v13 = vpack.c.bf16 %v3030_v43, %v3029_v38 }
 0x20f   : > { %v3003_v15 = vadd.f32 %v5485_v40, %v2964_v51  ;;  %v2965_v54 = vmul.f32 %v4390_v56, %v5480_v27 }
 0x210   : > { %v3001_v20 = vadd.f32 %v5485_v40, %v2962_v11  ;;  %v2963_v3 = vmul.f32 %v4391_v12, %v5480_v27  ;;  %4352 = vmatprep.mubr.bf16.mxu1 %v3057_v13 }
 0x211   : > { %v3004_v30 = vadd.f32 %v5485_v40, %v2965_v54  ;;  %4353 = vmatmul.mubr.bf16.gmra.mrb[40].mxu1 %v3058_v0  ;;  %v3035_v34 = vmax.f32 %v3003_v15, 0.0 }
 0x212   : > { %v3002_v4 = vadd.f32 %v5485_v40, %v2963_v3  ;;  %v4314_v28 = vpop.f32.mrb[16].mxu0  ;;  %v3033_v35 = vmax.f32 %v3001_v20, 0.0 }
 0x213   : > { %v3036_v39 = vmax.f32 %v3004_v30, 0.0  ;;  %v4392_v5 = vadd.f32 %v4314_v28, %v5445_v6  ;;  %v2848_v41 = vpop.f32.mrb[17].mxu0 }
 0x214   : > { %v3034_v42 = vmax.f32 %v3002_v4, 0.0  ;;  %v4393_v45 = vadd.f32 %v2848_v41, %v5447_v21  ;;  %v4315_v46 = vpop.f32.mrb[18].mxu0 }
 0x215   : > { %v2968_v59 = vmul.f32 %v4392_v5, %v5480_v27  ;;  %v4394_v2 = vadd.f32 %v4315_v46, %v5449_v22  ;;  %v2851_v29 = vpop.f32.mrb[19].mxu0  ;;  %v3060_v33 = vpack.c.bf16 %v3036_v39, %v3035_v34 }
 0x216   : > { %v2966_v60 = vmul.f32 %v4393_v45, %v5480_v27  ;;  %v4395_v61 = vadd.f32 %v2851_v29, %v5451_v25  ;;  %v3059_v62 = vpack.c.bf16 %v3034_v42, %v3033_v35 }
 0x217   : > { %v3007_v63 = vadd.f32 %v5485_v40, %v2968_v59  ;;  %v2969_v6 = vmul.f32 %v4394_v2, %v5480_v27 }
 0x218   : > { %v3005_v1 = vadd.f32 %v5485_v40, %v2966_v60  ;;  %v2967_v21 = vmul.f32 %v4395_v61, %v5480_v27  ;;  %4356 = vmatprep.mubr.bf16.mxu1 %v3059_v62 }
 0x219   : > { %v3008_v14 = vadd.f32 %v5485_v40, %v2969_v6  ;;  %4357 = vmatmul.mubr.bf16.gmra.mrb[44].mxu1 %v3060_v33  ;;  %v3039_v17 = vmax.f32 %v3007_v63, 0.0 }
 0x21a   : > { %v3006_v22 = vadd.f32 %v5485_v40, %v2967_v21  ;;  %v4318_v36 = vpop.f32.mrb[20].mxu0  ;;  %v3037_v52 = vmax.f32 %v3005_v1, 0.0 }
 0x21b   : > { %v3040_v49 = vmax.f32 %v3008_v14, 0.0  ;;  %v4396_v25 = vadd.f32 %v4318_v36, %v5453_v26  ;;  %v2864_v23 = vpop.f32.mrb[21].mxu0 }
 0x21c   : > { %v3038_v24 = vmax.f32 %v3006_v22, 0.0  ;;  %v4397_v31 = vadd.f32 %v2864_v23, %v5455_v47  ;;  %v4319_v32 = vpop.f32.mrb[22].mxu0 }
 0x21d   : > { %v2972_v53 = vmul.f32 %v4396_v25, %v5480_v27  ;;  %v4398_v37 = vadd.f32 %v4319_v32, %v5457_v48  ;;  %v2867_v38 = vpop.f32.mrb[23].mxu0  ;;  %v3062_v43 = vpack.c.bf16 %v3040_v49, %v3039_v17 }
 0x21e   : > { %v2970_v44 = vmul.f32 %v4397_v31, %v5480_v27  ;;  %v4399_v50 = vadd.f32 %v2867_v38, %v5459_v55  ;;  %v3061_v51 = vpack.c.bf16 %v3038_v24, %v3037_v52 }
 0x21f   : > { %v3011_v56 = vadd.f32 %v5485_v40, %v2972_v53  ;;  %v2973_v26 = vmul.f32 %v4398_v37, %v5480_v27 }
 0x220   : > { %v3009_v57 = vadd.f32 %v5485_v40, %v2970_v44  ;;  %v2971_v47 = vmul.f32 %v4399_v50, %v5480_v27  ;;  %4360 = vmatprep.mubr.bf16.mxu1 %v3061_v51 }
 0x221   : > { %v3012_v0 = vadd.f32 %v5485_v40, %v2973_v26  ;;  %4361 = vmatmul.mubr.bf16.gmra.mrb[48].mxu1 %v3062_v43  ;;  %v3043_v12 = vmax.f32 %v3011_v56, 0.0 }
 0x222   : > { %v3010_v48 = vadd.f32 %v5485_v40, %v2971_v47  ;;  %v4322_v11 = vpop.f32.mrb[24].mxu0  ;;  %v3041_v54 = vmax.f32 %v3009_v57, 0.0 }
 0x223   : > { %v3044_v13 = vmax.f32 %v3012_v0, 0.0  ;;  %v4400_v55 = vadd.f32 %v4322_v11, %v5461_v58  ;;  %v2880_v15 = vpop.f32.mrb[25].mxu0 }
 0x224   : > { %v3042_v20 = vmax.f32 %v3010_v48, 0.0  ;;  %v4401_v3 = vadd.f32 %v2880_v15, %v5463_v7  ;;  %v4323_v30 = vpop.f32.mrb[26].mxu0 }
 0x225   : > { %v2976_v4 = vmul.f32 %v4400_v55, %v5480_v27  ;;  %v4402_v28 = vadd.f32 %v4323_v30, %v5465_v8  ;;  %v2883_v34 = vpop.f32.mrb[27].mxu0  ;;  %v3064_v39 = vpack.c.bf16 %v3044_v13, %v3043_v12 }
 0x226   : > { %v2974_v5 = vmul.f32 %v4401_v3, %v5480_v27  ;;  %v4403_v41 = vadd.f32 %v2883_v34, %v5467_v9  ;;  %v3063_v35 = vpack.c.bf16 %v3042_v20, %v3041_v54 }
 0x227   : > { %v3015_v42 = vadd.f32 %v5485_v40, %v2976_v4  ;;  %v2977_v58 = vmul.f32 %v4402_v28, %v5480_v27 }
 0x228   : > { %v3013_v45 = vadd.f32 %v5485_v40, %v2974_v5  ;;  %v2975_v7 = vmul.f32 %v4403_v41, %v5480_v27  ;;  %4364 = vmatprep.mubr.bf16.mxu1 %v3063_v35 }
 0x229   : > { %v3016_v46 = vadd.f32 %v5485_v40, %v2977_v58  ;;  %4365 = vmatmul.mubr.bf16.gmra.mrb[52].mxu1 %v3064_v39  ;;  %v3047_v2 = vmax.f32 %v3015_v42, 0.0 }
 0x22a   : > { %v3014_v8 = vadd.f32 %v5485_v40, %v2975_v7  ;;  %v4326_v59 = vpop.f32.mrb[28].mxu0  ;;  %v3045_v60 = vmax.f32 %v3013_v45, 0.0 }
 0x22b   : > { %v3048_v29 = vmax.f32 %v3016_v46, 0.0  ;;  %v4404_v9 = vadd.f32 %v4326_v59, %v5469_v10  ;;  %v2896_v33 = vpop.f32.mrb[29].mxu0 }
 0x22c   : > { %v3046_v61 = vmax.f32 %v3014_v8, 0.0  ;;  %v4405_v62 = vadd.f32 %v2896_v33, %v5471_v16  ;;  %v4327_v63 = vpop.f32.mrb[30].mxu0 }
 0x22d   : > { %v2980_v6 = vmul.f32 %v4404_v9, %v5480_v27  ;;  %v4406_v1 = vadd.f32 %v4327_v63, %v5473_v18  ;;  %v2899_v21 = vpop.f32.mrb[31].mxu0  ;;  %v3066_v14 = vpack.c.bf16 %v3048_v29, %v3047_v2 }
 0x22e   : > { %v2978_v22 = vmul.f32 %v4405_v62, %v5480_v27  ;;  %v4407_v36 = vadd.f32 %v2899_v21, %v5475_v19  ;;  %v3065_v17 = vpack.c.bf16 %v3046_v61, %v3045_v60 }
 0x22f   : > { %v3019_v49 = vadd.f32 %v5485_v40, %v2980_v6  ;;  %v2981_v10 = vmul.f32 %v4406_v1, %v5480_v27 }
 0x230   : > { %v3017_v16 = vadd.f32 %v5485_v40, %v2978_v22  ;;  %v2979_v25 = vmul.f32 %v4407_v36, %v5480_v27  ;;  %4368 = vmatprep.mubr.bf16.mxu1 %v3065_v17  ;;  %v5581_v27 = vld [vmem:[%s5706_s5] ss:$0 sm:$0xff] }
 0x231   : > { %v3020_v18 = vadd.f32 %v5485_v40, %v2981_v10  ;;  %4369 = vmatmul.mubr.bf16.gmra.mrb[56].mxu1 %v3066_v14  ;;  %v3051_v52 = vmax.f32 %v3019_v49, 0.0 }
 0x232   : > { %v3018_v23 = vadd.f32 %v5485_v40, %v2979_v25  ;;  %v3049_v19 = vmax.f32 %v3017_v16, 0.0 }
 0x233   : > { %v3052_v24 = vmax.f32 %v3020_v18, 0.0 }
 0x234   : > { %v3050_v31 = vmax.f32 %v3018_v23, 0.0 }
 0x235   : > { %v3068_v32 = vpack.c.bf16 %v3052_v24, %v3051_v52 }
 0x236   : > { %v3067_v53 = vpack.c.bf16 %v3050_v31, %v3049_v19 }
 0x238   : > { %4372 = vmatprep.mubr.bf16.mxu1 %v3067_v53 }
 0x239   : > { %4373 = vmatmul.mubr.bf16.gmra.mrb[60].mxu1 %v3068_v32 }
 0x2d4   : > { %v4346_v37 = vpop.f32.mrb[32].mxu1 }
 0x2d5   : > { %v3183_v38 = vadd.f32 %v4346_v37, %v5581_v27  ;;  %v3174_v40 = vpop.f32.mrb[33].mxu1 }
 0x2d6   : > { %v3175_v43 = vadd.f32 %v5581_v27, %v3174_v40  ;;  %v4347_v44 = vpop.f32.mrb[34].mxu1 }
 0x2d7   : > { %3303 = vst [vmem:[%s5585_s16 + $0x10] sm:$0xff] %v3183_v38  ;;  %v3186_v50 = vadd.f32 %v4347_v44, %v5581_v27  ;;  %v3177_v51 = vpop.f32.mrb[35].mxu1 }
 0x2d8   : > { %3301 = vst [vmem:[%s5585_s16] sm:$0xff] %v3175_v43  ;;  %v3178_v56 = vadd.f32 %v5581_v27, %v3177_v51 }
 0x2d9   : > { %3304 = vst [vmem:[%s5585_s16 + $0x18] sm:$0xff] %v3186_v50 }
 0x2da   : > { %3302 = vst [vmem:[%s5585_s16 + $0x8] sm:$0xff] %v3178_v56 }
 0x2dc   : > { %v4350_v26 = vpop.f32.mrb[36].mxu1 }
 0x2dd   : > { %v3199_v57 = vadd.f32 %v4350_v26, %v5581_v27  ;;  %v3190_v47 = vpop.f32.mrb[37].mxu1 }
 0x2de   : > { %v3191_v0 = vadd.f32 %v5581_v27, %v3190_v47  ;;  %v4351_v48 = vpop.f32.mrb[38].mxu1 }
 0x2df   : > { %3307 = vst [vmem:[%s5585_s16 + $0x30] sm:$0xff] %v3199_v57  ;;  %v3202_v11 = vadd.f32 %v4351_v48, %v5581_v27  ;;  %v3193_v12 = vpop.f32.mrb[39].mxu1 }
 0x2e0   : > { %3305 = vst [vmem:[%s5585_s16 + $0x20] sm:$0xff] %v3191_v0  ;;  %v3194_v13 = vadd.f32 %v5581_v27, %v3193_v12 }
 0x2e1   : > { %3308 = vst [vmem:[%s5585_s16 + $0x38] sm:$0xff] %v3202_v11 }
 0x2e2   : > { %3306 = vst [vmem:[%s5585_s16 + $0x28] sm:$0xff] %v3194_v13 }
 0x2e4   : > { %v4354_v55 = vpop.f32.mrb[40].mxu1 }
 0x2e5   : > { %v3215_v15 = vadd.f32 %v4354_v55, %v5581_v27  ;;  %v3206_v54 = vpop.f32.mrb[41].mxu1 }
 0x2e6   : > { %v3207_v20 = vadd.f32 %v5581_v27, %v3206_v54  ;;  %v4355_v3 = vpop.f32.mrb[42].mxu1 }
 0x2e7   : > { %3311 = vst [vmem:[%s5585_s16 + $0x50] sm:$0xff] %v3215_v15  ;;  %v3218_v30 = vadd.f32 %v4355_v3, %v5581_v27  ;;  %v3209_v4 = vpop.f32.mrb[43].mxu1 }
 0x2e8   : > { %3309 = vst [vmem:[%s5585_s16 + $0x40] sm:$0xff] %v3207_v20  ;;  %v3210_v28 = vadd.f32 %v5581_v27, %v3209_v4 }
 0x2e9   : > { %3312 = vst [vmem:[%s5585_s16 + $0x58] sm:$0xff] %v3218_v30 }
 0x2ea   : > { %3310 = vst [vmem:[%s5585_s16 + $0x48] sm:$0xff] %v3210_v28 }
 0x2ec   : > { %v4358_v34 = vpop.f32.mrb[44].mxu1 }
 0x2ed   : > { %v3231_v39 = vadd.f32 %v4358_v34, %v5581_v27  ;;  %v3222_v5 = vpop.f32.mrb[45].mxu1 }
 0x2ee   : > { %v3223_v41 = vadd.f32 %v5581_v27, %v3222_v5  ;;  %v4359_v35 = vpop.f32.mrb[46].mxu1 }
 0x2ef   : > { %3315 = vst [vmem:[%s5585_s16 + $0x70] sm:$0xff] %v3231_v39  ;;  %v3234_v42 = vadd.f32 %v4359_v35, %v5581_v27  ;;  %v3225_v58 = vpop.f32.mrb[47].mxu1 }
 0x2f0   : > { %3313 = vst [vmem:[%s5585_s16 + $0x60] sm:$0xff] %v3223_v41  ;;  %v3226_v45 = vadd.f32 %v5581_v27, %v3225_v58 }
 0x2f1   : > { %3316 = vst [vmem:[%s5585_s16 + $0x78] sm:$0xff] %v3234_v42 }
 0x2f2   : > { %3314 = vst [vmem:[%s5585_s16 + $0x68] sm:$0xff] %v3226_v45 }
 0x2f4   : > { %v4362_v7 = vpop.f32.mrb[48].mxu1 }
 0x2f5   : > { %v3247_v46 = vadd.f32 %v4362_v7, %v5581_v27  ;;  %v3238_v8 = vpop.f32.mrb[49].mxu1 }
 0x2f6   : > { %v3239_v59 = vadd.f32 %v5581_v27, %v3238_v8  ;;  %v4363_v2 = vpop.f32.mrb[50].mxu1 }
 0x2f7   : > { %3319 = vst [vmem:[%s5585_s16 + $0x90] sm:$0xff] %v3247_v46  ;;  %v3250_v29 = vadd.f32 %v4363_v2, %v5581_v27  ;;  %v3241_v9 = vpop.f32.mrb[51].mxu1 }
 0x2f8   : > { %3317 = vst [vmem:[%s5585_s16 + $0x80] sm:$0xff] %v3239_v59  ;;  %v3242_v33 = vadd.f32 %v5581_v27, %v3241_v9 }
 0x2f9   : > { %3320 = vst [vmem:[%s5585_s16 + $0x98] sm:$0xff] %v3250_v29 }
 0x2fa   : > { %3318 = vst [vmem:[%s5585_s16 + $0x88] sm:$0xff] %v3242_v33 }
 0x2fc   : > { %v4366_v60 = vpop.f32.mrb[52].mxu1 }
 0x2fd   : > { %v3263_v61 = vadd.f32 %v4366_v60, %v5581_v27  ;;  %v3254_v62 = vpop.f32.mrb[53].mxu1 }
 0x2fe   : > { %v3255_v63 = vadd.f32 %v5581_v27, %v3254_v62  ;;  %v4367_v6 = vpop.f32.mrb[54].mxu1 }
 0x2ff   : > { %3323 = vst [vmem:[%s5585_s16 + $0xb0] sm:$0xff] %v3263_v61  ;;  %v3266_v1 = vadd.f32 %v4367_v6, %v5581_v27  ;;  %v3257_v21 = vpop.f32.mrb[55].mxu1 }
 0x300   : > { %3321 = vst [vmem:[%s5585_s16 + $0xa0] sm:$0xff] %v3255_v63  ;;  %v3258_v14 = vadd.f32 %v5581_v27, %v3257_v21 }
 0x301   : > { %3324 = vst [vmem:[%s5585_s16 + $0xb8] sm:$0xff] %v3266_v1 }
 0x302   : > { %3322 = vst [vmem:[%s5585_s16 + $0xa8] sm:$0xff] %v3258_v14 }
 0x304   : > { %v4370_v22 = vpop.f32.mrb[56].mxu1 }
 0x305   : > { %v3279_v36 = vadd.f32 %v4370_v22, %v5581_v27  ;;  %v3270_v17 = vpop.f32.mrb[57].mxu1 }
 0x306   : > { %v3271_v49 = vadd.f32 %v5581_v27, %v3270_v17  ;;  %v4371_v10 = vpop.f32.mrb[58].mxu1 }
 0x307   : > { %3327 = vst [vmem:[%s5585_s16 + $0xd0] sm:$0xff] %v3279_v36  ;;  %v3282_v16 = vadd.f32 %v4371_v10, %v5581_v27  ;;  %v3273_v25 = vpop.f32.mrb[59].mxu1 }
 0x308   : > { %3325 = vst [vmem:[%s5585_s16 + $0xc0] sm:$0xff] %v3271_v49  ;;  %v3274_v18 = vadd.f32 %v5581_v27, %v3273_v25 }
 0x309   : > { %3328 = vst [vmem:[%s5585_s16 + $0xd8] sm:$0xff] %v3282_v16 }
 0x30a   : > { %3326 = vst [vmem:[%s5585_s16 + $0xc8] sm:$0xff] %v3274_v18 }
 0x30c   : > { %v4374_v23 = vpop.f32.mrb[60].mxu1 }
 0x30d   : > { %v3295_v52 = vadd.f32 %v4374_v23, %v5581_v27  ;;  %v3286_v24 = vpop.f32.mrb[61].mxu1 }
 0x30e   : > { %v3287_v19 = vadd.f32 %v5581_v27, %v3286_v24  ;;  %v4375_v31 = vpop.f32.mrb[62].mxu1 }
 0x30f   : > { %3331 = vst [vmem:[%s5585_s16 + $0xf0] sm:$0xff] %v3295_v52  ;;  %v3298_v32 = vadd.f32 %v4375_v31, %v5581_v27  ;;  %v3289_v53 = vpop.f32.mrb[63].mxu1 }
 0x310   : > { %3329 = vst [vmem:[%s5585_s16 + $0xe0] sm:$0xff] %v3287_v19  ;;  %v3290_v37 = vadd.f32 %v5581_v27, %v3289_v53 }
 0x311   : > { %3332 = vst [vmem:[%s5585_s16 + $0xf8] sm:$0xff] %v3298_v32 }
 0x312   : > { %3330 = vst [vmem:[%s5585_s16 + $0xe8] sm:$0xff] %v3290_v37 }
 0x313   : > { %4713 = shalt.err (!%p4710_p3)
}
 0x314   : > { %s4714_s11 = scalar_lea.hbm %s5650_s20, 4096  ;;  %s4718_s14 = scalar_lea.hbm %s5707_s6, 8192 }
 0x315   : > { %p4715_p4 = scmp.ne.s32.totalorder %s5650_s20, %s4714_s11  ;;  %p4719_p9 = scmp.lt.u32.totalorder %s5650_s20, %s5707_s6 }
 0x316   : > { %p4720_p10 = scmp.lt.u32.totalorder %s4718_s14, %s4714_s11  ;;  %p4722_p12 = scmp.lt.u32.totalorder %s4714_s11, %s5650_s20 }
 0x317   : > { %p4716_p7 = pnand %p4715_p4, %p4840_p5 }
 0x318   : > { %p4721_p11 = por %p4720_p10, %p4719_p9 }
 0x319   : > { %p4717_p8 = pneg %p4716_p7 }
 0x31a   : > { %p4723_p13 = por %p4722_p12, %p4721_p11 }
 0x31c   : > { %p4724_p0 = pnand %p4723_p13, %p4717_p8 }
 0x31e   : > { %4727 = shalt.err (!%p4724_p0)
}
 0x31f   : > { %s4765_s17 = smov 128   ;;  %s4766_s29 = smov 8  }
 0x320   : > { %4633 = dma.vmem_to_hbm [thread:$0]  (%p4840_p5), %s5652_s18, 4096, %s5650_s20, %s5660_s25, %s4765_s17, %s4765_s17, %s4766_s29  }
 0x321 PF: > { %p4639_p1 = scmp.ge.s32.totalorder %s4762_s24, 2  ;;  %s3362_s19 = sand.u32 1, %s4750_s21  }
 0x322   : > { %s3363_s26 = scalar_lea.sflag [#allocation3], %s3362_s19 }
 0x323   : > { %p4636_p2 = pnand %p4639_p1, %p4844_p6 }
 0x325   : > { %4745 = dma.done.wait (!%p4636_p2), %s3363_s26, 4096  }
 0x326   : > { %4747 = vsyncadd (!%p4636_p2), %s3363_s26, 4294963200  ;;  %p16_p3 = scmp.ge.s32.totalorder %s4827_s27, 4   ;;  %s5710_s21 = smov %s4754_s22 }
 0x327   : > { %s5711_s22 = smov %s4758_s23  ;;  %s5712_s23 = smov %s4838_s30 }
 0x328   : > { %s5713_s24 = smov %s4827_s27  ;;  %18 = sbr.rel (!%p16_p3) target bundleno = 3 (0x3), region = 89 }
 0x32f   :  { %3368 = vsyncpa [#allocation3], 1 }
 0x330   :  { %3370 = vsyncpa [#allocation3 + $0x1], 1 }

</bundles_post_ra>
